<compile_context>
chip_gen: v7x
topology: tpu7x:2x2x1
jax: 0.10.0
libtpu: 0.0.40
codegen_flags: <defaults>
</compile_context>

<pallas_src>
import functools

import jax
import jax.numpy as jnp
from jax.experimental import pallas as pl
from jax.experimental.pallas import tpu as pltpu


def _asp_kernel(x_ref, w1_ref, b1_ref, w2_ref, b2_ref, out_ref):
    # x_ref:  [Bt, C, T]   native NCT layout (no wrapper transpose)
    # w1_ref: [Kb, C]      first 1x1 conv weight
    # b1_ref: [Kb, 1]
    # w2_ref: [C, Kb]      second 1x1 conv weight
    # b2_ref: [C, 1]
    # out_ref:[Bt, 2C]
    bt, c, _t = x_ref.shape

    w1 = w1_ref[...]
    b1 = b1_ref[...]
    w2 = w2_ref[...]
    b2 = b2_ref[...]

    # Bt is small and static -> unrolled loop (LLO sees the whole schedule).
    for i in range(bt):
        x = x_ref[i]  # [C, T], float32

        # attention bottleneck: Conv1d(C->Kb, k=1) + tanh  (MXU + EUP)
        h = jnp.tanh(
            jnp.dot(w1, x, preferred_element_type=jnp.float32) + b1
        )  # [Kb, T]

        # Conv1d(Kb->C, k=1)
        logits = jnp.dot(h=None, *()) if False else (
            jnp.dot(w2, h, preferred_element_type=jnp.float32) + b2
        )  # [C, T]

        # softmax over time (lane axis) with deferred normalization
        m = jnp.max(logits, axis=-1, keepdims=True)   # [C, 1]
        e = jnp.exp(logits - m)                       # [C, T]
        ex = e * x                                    # [C, T]

        s0 = jnp.sum(e, axis=-1)                      # [C]
        s1 = jnp.sum(ex, axis=-1)                     # [C]
        s2 = jnp.sum(ex * x, axis=-1)                 # [C]

        inv = pl.reciprocal(s0, approx=True)          # [C]
        mean = s1 * inv                               # [C]
        var = jnp.maximum(s2 * inv - mean * mean, 0.0)
        std = jnp.sqrt(var + 1e-7)                    # [C]

        # two direct slice stores (no concat temporary)
        out_ref[i, 0:c] = mean
        out_ref[i, c:2 * c] = std


@functools.partial(jax.jit, static_argnames=("block_b",))
def attentive_statistics_pooling(x_bct, w1, b1, w2, b2, *, block_b=8):
    """x_bct: [B, C, T] float32 (PyTorch layout). Returns [B, 2C]."""
    B, C, T = x_bct.shape
    Kb = w1.shape[0]  # bottleneck

    x = x_bct.astype(jnp.float32)
    bt = min(block_b, B)
    g = pl.cdiv(B, bt)
    b_pad = g * bt
    if b_pad != B:
        # zero padding is safe: padded rows give mean=0, std=sqrt(1e-7), sliced off
        x = jnp.pad(x, ((0, b_pad - B), (0, 0), (0, 0)))

    w1f = w1.astype(jnp.float32)                 # [Kb, C]
    w2f = w2.astype(jnp.float32)                 # [C, Kb]
    b1c = b1.reshape(Kb, 1).astype(jnp.float32)  # [Kb, 1]
    b2c = b2.reshape(C, 1).astype(jnp.float32)   # [C, 1]

    out = pl.pallas_call(
        _asp_kernel,
        out_shape=jax.ShapeDtypeStruct((b_pad, 2 * C), jnp.float32),
        grid_spec=pltpu.PrefetchScalarGridSpec(
            num_scalar_prefetch=0,
            grid=(g,),
            in_specs=[
                pl.BlockSpec((bt, C, T), lambda b: (b, 0, 0)),
                pl.BlockSpec((Kb, C), lambda b: (0, 0)),
                pl.BlockSpec((Kb, 1), lambda b: (0, 0)),
                pl.BlockSpec((C, Kb), lambda b: (0, 0)),
                pl.BlockSpec((C, 1), lambda b: (0, 0)),
            ],
            out_specs=pl.BlockSpec((bt, 2 * C), lambda b: (b, 0)),
        ),
        compiler_params=pltpu.CompilerParams(
            dimension_semantics=("parallel",),
            # raise scoped VMEM above the 16/32 MiB defaults so big [C,T] tiles
            # and the double-buffered input DMA are not throttled
            vmem_limit_bytes=64 * 1024 * 1024,
        ),
    )(x, w1f, b1c, w2f, b2c)
    return out[:B]


def _reference(x_bct, w1, b1, w2, b2):
    # pure-JAX reference mirroring the PyTorch module
    h = jnp.tanh(jnp.einsum("kc,bct->bkt", w1, x_bct) + b1[None, :, None])
    logits = jnp.einsum("ck,bkt->bct", w2, h) + b2[None, :, None]
    w = jax.nn.softmax(logits, axis=-1)
    mean = jnp.sum(w * x_bct, axis=-1)
    var = jnp.sum(w * x_bct ** 2, axis=-1) - mean ** 2
    return jnp.concatenate([mean, jnp.sqrt(var + 1e-7)], axis=-1)


if __name__ == "__main__":
    # small shapes; B=10 also exercises the batch-block padding + 2-step grid
    B, C, T, BOTTLENECK = 10, 16, 32, 8

    key = jax.random.PRNGKey(0)
    kx, k1, k2, k3, k4 = jax.random.split(key, 5)

    # PyTorch Conv1d-shaped params (kernel size 1 squeezed away):
    #   conv1: weight [bottleneck, C], bias [bottleneck]
    #   conv2: weight [C, bottleneck], bias [C]
    bound1 = 1.0 / (C ** 0.5)
    bound2 = 1.0 / (BOTTLENECK ** 0.5)
    w1 = jax.random.uniform(k1, (BOTTLENECK, C), jnp.float32, -bound1, bound1)
    b1 = jax.random.uniform(k2, (BOTTLENECK,), jnp.float32, -bound1, bound1)
    w2 = jax.random.uniform(k3, (C, BOTTLENECK), jnp.float32, -bound2, bound2)
    b2 = jax.random.uniform(k4, (C,), jnp.float32, -bound2, bound2)

    x = jax.random.normal(kx, (B, C, T), jnp.float32)

    out = attentive_statistics_pooling(x, w1, b1, w2, b2)
    out = jax.block_until_ready(out)

    ref = _reference(x, w1, b1, w2, b2)
    assert out.shape == (B, 2 * C), out.shape
    # tolerance is modest because the kernel uses pl.reciprocal(approx=True)
    # for the softmax denominator (all other math is f32)
    assert jnp.allclose(out, ref, atol=2e-3, rtol=2e-3), (
        "mismatch vs reference: max abs err "
        f"{float(jnp.max(jnp.abs(out - ref)))}"
    )
    print("KERNEL_OK")
</pallas_src>

<mosaic_0001>
module attributes {stable_mosaic.version = 11 : i64} {
  func.func @_asp_kernel(%arg0: i32, %arg1: memref<8x16x32xf32, #tpu.memory_space<vmem>>, %arg2: memref<8x16xf32, #tpu.memory_space<vmem>>, %arg3: memref<8x1xf32, #tpu.memory_space<vmem>>, %arg4: memref<16x8xf32, #tpu.memory_space<vmem>>, %arg5: memref<16x1xf32, #tpu.memory_space<vmem>>, %arg6: memref<8x32xf32, #tpu.memory_space<vmem>>) attributes {dimension_semantics = [#tpu.dimension_semantics<parallel>], iteration_bounds = array<i64: 2>, scalar_prefetch = 0 : i64, scratch_operands = 0 : i64, tpu.core_type = #tpu.core_type<tc>, window_params = [{transform_indices = @transform_0, window_bounds = array<i64: 8, 16, 32>}, {pipeline_mode = #tpu.pipeline_mode<synchronous>, transform_indices = @transform_1, window_bounds = array<i64: 8, 16>}, {pipeline_mode = #tpu.pipeline_mode<synchronous>, transform_indices = @transform_2, window_bounds = array<i64: 8, 1>}, {pipeline_mode = #tpu.pipeline_mode<synchronous>, transform_indices = @transform_3, window_bounds = array<i64: 16, 8>}, {pipeline_mode = #tpu.pipeline_mode<synchronous>, transform_indices = @transform_4, window_bounds = array<i64: 16, 1>}, {transform_indices = @transform_5, window_bounds = array<i64: 8, 32>}]} {
    %c0 = arith.constant 0 : index
    %c0_0 = arith.constant 0 : index
    %0 = vector.load %arg2[%c0, %c0_0] : memref<8x16xf32, #tpu.memory_space<vmem>>, vector<8x16xf32>
    %c0_1 = arith.constant 0 : index
    %c0_2 = arith.constant 0 : index
    %1 = vector.load %arg3[%c0_1, %c0_2] : memref<8x1xf32, #tpu.memory_space<vmem>>, vector<8x1xf32>
    %c0_3 = arith.constant 0 : index
    %c0_4 = arith.constant 0 : index
    %2 = vector.load %arg4[%c0_3, %c0_4] : memref<16x8xf32, #tpu.memory_space<vmem>>, vector<16x8xf32>
    %c0_5 = arith.constant 0 : index
    %c0_6 = arith.constant 0 : index
    %3 = vector.load %arg5[%c0_5, %c0_6] : memref<16x1xf32, #tpu.memory_space<vmem>>, vector<16x1xf32>
    %c0_7 = arith.constant 0 : index
    %c0_8 = arith.constant 0 : index
    %c0_9 = arith.constant 0 : index
    %4 = vector.load %arg1[%c0_7, %c0_8, %c0_9] : memref<8x16x32xf32, #tpu.memory_space<vmem>>, vector<1x16x32xf32>
    %5 = vector.shape_cast %4 : vector<1x16x32xf32> to vector<16x32xf32>
    %cst = arith.constant dense<0.000000e+00> : vector<8x32xf32>
    %6 = tpu.matmul %0, %5, %cst {dimension_numbers = #tpu.dot_dimension_numbers<[1], [0], [0], [1], [0, 0, 1, 1], [], []>} : vector<8x16xf32>, vector<16x32xf32>, vector<8x32xf32> -> vector<8x32xf32>
    %7 = vector.broadcast %1 : vector<8x1xf32> to vector<8x32xf32>
    %8 = arith.addf %6, %7 : vector<8x32xf32>
    %9 = math.tanh %8 : vector<8x32xf32>
    %cst_10 = arith.constant dense<0.000000e+00> : vector<16x32xf32>
    %10 = tpu.matmul %2, %9, %cst_10 {dimension_numbers = #tpu.dot_dimension_numbers<[1], [0], [0], [1], [0, 0, 1, 1], [], []>} : vector<16x8xf32>, vector<8x32xf32>, vector<16x32xf32> -> vector<16x32xf32>
    %11 = vector.broadcast %3 : vector<16x1xf32> to vector<16x32xf32>
    %12 = arith.addf %10, %11 : vector<16x32xf32>
    %cst_11 = arith.constant dense<0xFF800000> : vector<16xf32>
    %13 = vector.multi_reduction <maximumf>, %12, %cst_11 [1] : vector<16x32xf32> to vector<16xf32>
    %14 = vector.shape_cast %13 : vector<16xf32> to vector<16x1xf32>
    %15 = vector.broadcast %14 : vector<16x1xf32> to vector<16x32xf32>
    %16 = arith.subf %12, %15 : vector<16x32xf32>
    %17 = math.exp %16 : vector<16x32xf32>
    %18 = arith.mulf %17, %5 : vector<16x32xf32>
    %cst_12 = arith.constant dense<0.000000e+00> : vector<16xf32>
    %19 = vector.multi_reduction <add>, %17, %cst_12 [1] : vector<16x32xf32> to vector<16xf32>
    %cst_13 = arith.constant dense<0.000000e+00> : vector<16xf32>
    %20 = vector.multi_reduction <add>, %18, %cst_13 [1] : vector<16x32xf32> to vector<16xf32>
    %21 = arith.mulf %18, %5 : vector<16x32xf32>
    %cst_14 = arith.constant dense<0.000000e+00> : vector<16xf32>
    %22 = vector.multi_reduction <add>, %21, %cst_14 [1] : vector<16x32xf32> to vector<16xf32>
    %23 = tpu.reciprocal %19 {approx = true} : vector<16xf32> -> vector<16xf32>
    %24 = arith.mulf %20, %23 : vector<16xf32>
    %25 = arith.mulf %22, %23 : vector<16xf32>
    %26 = arith.mulf %24, %24 : vector<16xf32>
    %27 = arith.subf %25, %26 : vector<16xf32>
    %cst_15 = arith.constant 0.000000e+00 : f32
    %28 = vector.broadcast %cst_15 : f32 to vector<16xf32>
    %29 = arith.maximumf %27, %28 : vector<16xf32>
    %cst_16 = arith.constant 1.000000e-07 : f32
    %30 = vector.broadcast %cst_16 : f32 to vector<16xf32>
    %31 = arith.addf %29, %30 : vector<16xf32>
    %32 = math.sqrt %31 : vector<16xf32>
    %c0_17 = arith.constant 0 : index
    %c0_18 = arith.constant 0 : index
    %33 = vector.load %arg6[%c0_17, %c0_18] : memref<8x32xf32, #tpu.memory_space<vmem>>, vector<1x16xf32>
    %34 = vector.shape_cast %33 : vector<1x16xf32> to vector<16xf32>
    %35 = vector.shape_cast %24 : vector<16xf32> to vector<1x16xf32>
    tpu.vector_store %arg6[%c0_17, %c0_18], %35 {strides = array<i32>} : memref<8x32xf32, #tpu.memory_space<vmem>>, vector<1x16xf32>,
    %c0_19 = arith.constant 0 : index
    %c16 = arith.constant 16 : index
    %36 = vector.load %arg6[%c0_19, %c16] : memref<8x32xf32, #tpu.memory_space<vmem>>, vector<1x16xf32>
    %37 = vector.shape_cast %36 : vector<1x16xf32> to vector<16xf32>
    %38 = vector.shape_cast %32 : vector<16xf32> to vector<1x16xf32>
    tpu.vector_store %arg6[%c0_19, %c16], %38 {strides = array<i32>} : memref<8x32xf32, #tpu.memory_space<vmem>>, vector<1x16xf32>,
    %c1 = arith.constant 1 : index
    %c0_20 = arith.constant 0 : index
    %c0_21 = arith.constant 0 : index
    %39 = vector.load %arg1[%c1, %c0_20, %c0_21] : memref<8x16x32xf32, #tpu.memory_space<vmem>>, vector<1x16x32xf32>
    %40 = vector.shape_cast %39 : vector<1x16x32xf32> to vector<16x32xf32>
    %cst_22 = arith.constant dense<0.000000e+00> : vector<8x32xf32>
    %41 = tpu.matmul %0, %40, %cst_22 {dimension_numbers = #tpu.dot_dimension_numbers<[1], [0], [0], [1], [0, 0, 1, 1], [], []>} : vector<8x16xf32>, vector<16x32xf32>, vector<8x32xf32> -> vector<8x32xf32>
    %42 = vector.broadcast %1 : vector<8x1xf32> to vector<8x32xf32>
    %43 = arith.addf %41, %42 : vector<8x32xf32>
    %44 = math.tanh %43 : vector<8x32xf32>
    %cst_23 = arith.constant dense<0.000000e+00> : vector<16x32xf32>
    %45 = tpu.matmul %2, %44, %cst_23 {dimension_numbers = #tpu.dot_dimension_numbers<[1], [0], [0], [1], [0, 0, 1, 1], [], []>} : vector<16x8xf32>, vector<8x32xf32>, vector<16x32xf32> -> vector<16x32xf32>
    %46 = vector.broadcast %3 : vector<16x1xf32> to vector<16x32xf32>
    %47 = arith.addf %45, %46 : vector<16x32xf32>
    %cst_24 = arith.constant dense<0xFF800000> : vector<16xf32>
    %48 = vector.multi_reduction <maximumf>, %47, %cst_24 [1] : vector<16x32xf32> to vector<16xf32>
    %49 = vector.shape_cast %48 : vector<16xf32> to vector<16x1xf32>
    %50 = vector.broadcast %49 : vector<16x1xf32> to vector<16x32xf32>
    %51 = arith.subf %47, %50 : vector<16x32xf32>
    %52 = math.exp %51 : vector<16x32xf32>
    %53 = arith.mulf %52, %40 : vector<16x32xf32>
    %cst_25 = arith.constant dense<0.000000e+00> : vector<16xf32>
    %54 = vector.multi_reduction <add>, %52, %cst_25 [1] : vector<16x32xf32> to vector<16xf32>
    %cst_26 = arith.constant dense<0.000000e+00> : vector<16xf32>
    %55 = vector.multi_reduction <add>, %53, %cst_26 [1] : vector<16x32xf32> to vector<16xf32>
    %56 = arith.mulf %53, %40 : vector<16x32xf32>
    %cst_27 = arith.constant dense<0.000000e+00> : vector<16xf32>
    %57 = vector.multi_reduction <add>, %56, %cst_27 [1] : vector<16x32xf32> to vector<16xf32>
    %58 = tpu.reciprocal %54 {approx = true} : vector<16xf32> -> vector<16xf32>
    %59 = arith.mulf %55, %58 : vector<16xf32>
    %60 = arith.mulf %57, %58 : vector<16xf32>
    %61 = arith.mulf %59, %59 : vector<16xf32>
    %62 = arith.subf %60, %61 : vector<16xf32>
    %cst_28 = arith.constant 0.000000e+00 : f32
    %63 = vector.broadcast %cst_28 : f32 to vector<16xf32>
    %64 = arith.maximumf %62, %63 : vector<16xf32>
    %cst_29 = arith.constant 1.000000e-07 : f32
    %65 = vector.broadcast %cst_29 : f32 to vector<16xf32>
    %66 = arith.addf %64, %65 : vector<16xf32>
    %67 = math.sqrt %66 : vector<16xf32>
    %c1_30 = arith.constant 1 : index
    %c0_31 = arith.constant 0 : index
    %68 = vector.load %arg6[%c1_30, %c0_31] : memref<8x32xf32, #tpu.memory_space<vmem>>, vector<1x16xf32>
    %69 = vector.shape_cast %68 : vector<1x16xf32> to vector<16xf32>
    %70 = vector.shape_cast %59 : vector<16xf32> to vector<1x16xf32>
    tpu.vector_store %arg6[%c1_30, %c0_31], %70 {strides = array<i32>} : memref<8x32xf32, #tpu.memory_space<vmem>>, vector<1x16xf32>,
    %c1_32 = arith.constant 1 : index
    %c16_33 = arith.constant 16 : index
    %71 = vector.load %arg6[%c1_32, %c16_33] : memref<8x32xf32, #tpu.memory_space<vmem>>, vector<1x16xf32>
    %72 = vector.shape_cast %71 : vector<1x16xf32> to vector<16xf32>
    %73 = vector.shape_cast %67 : vector<16xf32> to vector<1x16xf32>
    tpu.vector_store %arg6[%c1_32, %c16_33], %73 {strides = array<i32>} : memref<8x32xf32, #tpu.memory_space<vmem>>, vector<1x16xf32>,
    %c2 = arith.constant 2 : index
    %c0_34 = arith.constant 0 : index
    %c0_35 = arith.constant 0 : index
    %74 = vector.load %arg1[%c2, %c0_34, %c0_35] : memref<8x16x32xf32, #tpu.memory_space<vmem>>, vector<1x16x32xf32>
    %75 = vector.shape_cast %74 : vector<1x16x32xf32> to vector<16x32xf32>
    %cst_36 = arith.constant dense<0.000000e+00> : vector<8x32xf32>
    %76 = tpu.matmul %0, %75, %cst_36 {dimension_numbers = #tpu.dot_dimension_numbers<[1], [0], [0], [1], [0, 0, 1, 1], [], []>} : vector<8x16xf32>, vector<16x32xf32>, vector<8x32xf32> -> vector<8x32xf32>
    %77 = vector.broadcast %1 : vector<8x1xf32> to vector<8x32xf32>
    %78 = arith.addf %76, %77 : vector<8x32xf32>
    %79 = math.tanh %78 : vector<8x32xf32>
    %cst_37 = arith.constant dense<0.000000e+00> : vector<16x32xf32>
    %80 = tpu.matmul %2, %79, %cst_37 {dimension_numbers = #tpu.dot_dimension_numbers<[1], [0], [0], [1], [0, 0, 1, 1], [], []>} : vector<16x8xf32>, vector<8x32xf32>, vector<16x32xf32> -> vector<16x32xf32>
    %81 = vector.broadcast %3 : vector<16x1xf32> to vector<16x32xf32>
    %82 = arith.addf %80, %81 : vector<16x32xf32>
    %cst_38 = arith.constant dense<0xFF800000> : vector<16xf32>
    %83 = vector.multi_reduction <maximumf>, %82, %cst_38 [1] : vector<16x32xf32> to vector<16xf32>
    %84 = vector.shape_cast %83 : vector<16xf32> to vector<16x1xf32>
    %85 = vector.broadcast %84 : vector<16x1xf32> to vector<16x32xf32>
    %86 = arith.subf %82, %85 : vector<16x32xf32>
    %87 = math.exp %86 : vector<16x32xf32>
    %88 = arith.mulf %87, %75 : vector<16x32xf32>
    %cst_39 = arith.constant dense<0.000000e+00> : vector<16xf32>
    %89 = vector.multi_reduction <add>, %87, %cst_39 [1] : vector<16x32xf32> to vector<16xf32>
    %cst_40 = arith.constant dense<0.000000e+00> : vector<16xf32>
    %90 = vector.multi_reduction <add>, %88, %cst_40 [1] : vector<16x32xf32> to vector<16xf32>
    %91 = arith.mulf %88, %75 : vector<16x32xf32>
    %cst_41 = arith.constant dense<0.000000e+00> : vector<16xf32>
    %92 = vector.multi_reduction <add>, %91, %cst_41 [1] : vector<16x32xf32> to vector<16xf32>
    %93 = tpu.reciprocal %89 {approx = true} : vector<16xf32> -> vector<16xf32>
    %94 = arith.mulf %90, %93 : vector<16xf32>
    %95 = arith.mulf %92, %93 : vector<16xf32>
    %96 = arith.mulf %94, %94 : vector<16xf32>
    %97 = arith.subf %95, %96 : vector<16xf32>
    %cst_42 = arith.constant 0.000000e+00 : f32
    %98 = vector.broadcast %cst_42 : f32 to vector<16xf32>
    %99 = arith.maximumf %97, %98 : vector<16xf32>
    %cst_43 = arith.constant 1.000000e-07 : f32
    %100 = vector.broadcast %cst_43 : f32 to vector<16xf32>
    %101 = arith.addf %99, %100 : vector<16xf32>
    %102 = math.sqrt %101 : vector<16xf32>
    %c2_44 = arith.constant 2 : index
    %c0_45 = arith.constant 0 : index
    %103 = vector.load %arg6[%c2_44, %c0_45] : memref<8x32xf32, #tpu.memory_space<vmem>>, vector<1x16xf32>
    %104 = vector.shape_cast %103 : vector<1x16xf32> to vector<16xf32>
    %105 = vector.shape_cast %94 : vector<16xf32> to vector<1x16xf32>
    tpu.vector_store %arg6[%c2_44, %c0_45], %105 {strides = array<i32>} : memref<8x32xf32, #tpu.memory_space<vmem>>, vector<1x16xf32>,
    %c2_46 = arith.constant 2 : index
    %c16_47 = arith.constant 16 : index
    %106 = vector.load %arg6[%c2_46, %c16_47] : memref<8x32xf32, #tpu.memory_space<vmem>>, vector<1x16xf32>
    %107 = vector.shape_cast %106 : vector<1x16xf32> to vector<16xf32>
    %108 = vector.shape_cast %102 : vector<16xf32> to vector<1x16xf32>
    tpu.vector_store %arg6[%c2_46, %c16_47], %108 {strides = array<i32>} : memref<8x32xf32, #tpu.memory_space<vmem>>, vector<1x16xf32>,
    %c3 = arith.constant 3 : index
    %c0_48 = arith.constant 0 : index
    %c0_49 = arith.constant 0 : index
    %109 = vector.load %arg1[%c3, %c0_48, %c0_49] : memref<8x16x32xf32, #tpu.memory_space<vmem>>, vector<1x16x32xf32>
    %110 = vector.shape_cast %109 : vector<1x16x32xf32> to vector<16x32xf32>
    %cst_50 = arith.constant dense<0.000000e+00> : vector<8x32xf32>
    %111 = tpu.matmul %0, %110, %cst_50 {dimension_numbers = #tpu.dot_dimension_numbers<[1], [0], [0], [1], [0, 0, 1, 1], [], []>} : vector<8x16xf32>, vector<16x32xf32>, vector<8x32xf32> -> vector<8x32xf32>
    %112 = vector.broadcast %1 : vector<8x1xf32> to vector<8x32xf32>
    %113 = arith.addf %111, %112 : vector<8x32xf32>
    %114 = math.tanh %113 : vector<8x32xf32>
    %cst_51 = arith.constant dense<0.000000e+00> : vector<16x32xf32>
    %115 = tpu.matmul %2, %114, %cst_51 {dimension_numbers = #tpu.dot_dimension_numbers<[1], [0], [0], [1], [0, 0, 1, 1], [], []>} : vector<16x8xf32>, vector<8x32xf32>, vector<16x32xf32> -> vector<16x32xf32>
    %116 = vector.broadcast %3 : vector<16x1xf32> to vector<16x32xf32>
    %117 = arith.addf %115, %116 : vector<16x32xf32>
    %cst_52 = arith.constant dense<0xFF800000> : vector<16xf32>
    %118 = vector.multi_reduction <maximumf>, %117, %cst_52 [1] : vector<16x32xf32> to vector<16xf32>
    %119 = vector.shape_cast %118 : vector<16xf32> to vector<16x1xf32>
    %120 = vector.broadcast %119 : vector<16x1xf32> to vector<16x32xf32>
    %121 = arith.subf %117, %120 : vector<16x32xf32>
    %122 = math.exp %121 : vector<16x32xf32>
    %123 = arith.mulf %122, %110 : vector<16x32xf32>
    %cst_53 = arith.constant dense<0.000000e+00> : vector<16xf32>
    %124 = vector.multi_reduction <add>, %122, %cst_53 [1] : vector<16x32xf32> to vector<16xf32>
    %cst_54 = arith.constant dense<0.000000e+00> : vector<16xf32>
    %125 = vector.multi_reduction <add>, %123, %cst_54 [1] : vector<16x32xf32> to vector<16xf32>
    %126 = arith.mulf %123, %110 : vector<16x32xf32>
    %cst_55 = arith.constant dense<0.000000e+00> : vector<16xf32>
    %127 = vector.multi_reduction <add>, %126, %cst_55 [1] : vector<16x32xf32> to vector<16xf32>
    %128 = tpu.reciprocal %124 {approx = true} : vector<16xf32> -> vector<16xf32>
    %129 = arith.mulf %125, %128 : vector<16xf32>
    %130 = arith.mulf %127, %128 : vector<16xf32>
    %131 = arith.mulf %129, %129 : vector<16xf32>
    %132 = arith.subf %130, %131 : vector<16xf32>
    %cst_56 = arith.constant 0.000000e+00 : f32
    %133 = vector.broadcast %cst_56 : f32 to vector<16xf32>
    %134 = arith.maximumf %132, %133 : vector<16xf32>
    %cst_57 = arith.constant 1.000000e-07 : f32
    %135 = vector.broadcast %cst_57 : f32 to vector<16xf32>
    %136 = arith.addf %134, %135 : vector<16xf32>
    %137 = math.sqrt %136 : vector<16xf32>
    %c3_58 = arith.constant 3 : index
    %c0_59 = arith.constant 0 : index
    %138 = vector.load %arg6[%c3_58, %c0_59] : memref<8x32xf32, #tpu.memory_space<vmem>>, vector<1x16xf32>
    %139 = vector.shape_cast %138 : vector<1x16xf32> to vector<16xf32>
    %140 = vector.shape_cast %129 : vector<16xf32> to vector<1x16xf32>
    tpu.vector_store %arg6[%c3_58, %c0_59], %140 {strides = array<i32>} : memref<8x32xf32, #tpu.memory_space<vmem>>, vector<1x16xf32>,
    %c3_60 = arith.constant 3 : index
    %c16_61 = arith.constant 16 : index
    %141 = vector.load %arg6[%c3_60, %c16_61] : memref<8x32xf32, #tpu.memory_space<vmem>>, vector<1x16xf32>
    %142 = vector.shape_cast %141 : vector<1x16xf32> to vector<16xf32>
    %143 = vector.shape_cast %137 : vector<16xf32> to vector<1x16xf32>
    tpu.vector_store %arg6[%c3_60, %c16_61], %143 {strides = array<i32>} : memref<8x32xf32, #tpu.memory_space<vmem>>, vector<1x16xf32>,
    %c4 = arith.constant 4 : index
    %c0_62 = arith.constant 0 : index
    %c0_63 = arith.constant 0 : index
    %144 = vector.load %arg1[%c4, %c0_62, %c0_63] : memref<8x16x32xf32, #tpu.memory_space<vmem>>, vector<1x16x32xf32>
    %145 = vector.shape_cast %144 : vector<1x16x32xf32> to vector<16x32xf32>
    %cst_64 = arith.constant dense<0.000000e+00> : vector<8x32xf32>
    %146 = tpu.matmul %0, %145, %cst_64 {dimension_numbers = #tpu.dot_dimension_numbers<[1], [0], [0], [1], [0, 0, 1, 1], [], []>} : vector<8x16xf32>, vector<16x32xf32>, vector<8x32xf32> -> vector<8x32xf32>
    %147 = vector.broadcast %1 : vector<8x1xf32> to vector<8x32xf32>
    %148 = arith.addf %146, %147 : vector<8x32xf32>
    %149 = math.tanh %148 : vector<8x32xf32>
    %cst_65 = arith.constant dense<0.000000e+00> : vector<16x32xf32>
    %150 = tpu.matmul %2, %149, %cst_65 {dimension_numbers = #tpu.dot_dimension_numbers<[1], [0], [0], [1], [0, 0, 1, 1], [], []>} : vector<16x8xf32>, vector<8x32xf32>, vector<16x32xf32> -> vector<16x32xf32>
    %151 = vector.broadcast %3 : vector<16x1xf32> to vector<16x32xf32>
    %152 = arith.addf %150, %151 : vector<16x32xf32>
    %cst_66 = arith.constant dense<0xFF800000> : vector<16xf32>
    %153 = vector.multi_reduction <maximumf>, %152, %cst_66 [1] : vector<16x32xf32> to vector<16xf32>
    %154 = vector.shape_cast %153 : vector<16xf32> to vector<16x1xf32>
    %155 = vector.broadcast %154 : vector<16x1xf32> to vector<16x32xf32>
    %156 = arith.subf %152, %155 : vector<16x32xf32>
    %157 = math.exp %156 : vector<16x32xf32>
    %158 = arith.mulf %157, %145 : vector<16x32xf32>
    %cst_67 = arith.constant dense<0.000000e+00> : vector<16xf32>
    %159 = vector.multi_reduction <add>, %157, %cst_67 [1] : vector<16x32xf32> to vector<16xf32>
    %cst_68 = arith.constant dense<0.000000e+00> : vector<16xf32>
    %160 = vector.multi_reduction <add>, %158, %cst_68 [1] : vector<16x32xf32> to vector<16xf32>
    %161 = arith.mulf %158, %145 : vector<16x32xf32>
    %cst_69 = arith.constant dense<0.000000e+00> : vector<16xf32>
    %162 = vector.multi_reduction <add>, %161, %cst_69 [1] : vector<16x32xf32> to vector<16xf32>
    %163 = tpu.reciprocal %159 {approx = true} : vector<16xf32> -> vector<16xf32>
    %164 = arith.mulf %160, %163 : vector<16xf32>
    %165 = arith.mulf %162, %163 : vector<16xf32>
    %166 = arith.mulf %164, %164 : vector<16xf32>
    %167 = arith.subf %165, %166 : vector<16xf32>
    %cst_70 = arith.constant 0.000000e+00 : f32
    %168 = vector.broadcast %cst_70 : f32 to vector<16xf32>
    %169 = arith.maximumf %167, %168 : vector<16xf32>
    %cst_71 = arith.constant 1.000000e-07 : f32
    %170 = vector.broadcast %cst_71 : f32 to vector<16xf32>
    %171 = arith.addf %169, %170 : vector<16xf32>
    %172 = math.sqrt %171 : vector<16xf32>
    %c4_72 = arith.constant 4 : index
    %c0_73 = arith.constant 0 : index
    %173 = vector.load %arg6[%c4_72, %c0_73] : memref<8x32xf32, #tpu.memory_space<vmem>>, vector<1x16xf32>
    %174 = vector.shape_cast %173 : vector<1x16xf32> to vector<16xf32>
    %175 = vector.shape_cast %164 : vector<16xf32> to vector<1x16xf32>
    tpu.vector_store %arg6[%c4_72, %c0_73], %175 {strides = array<i32>} : memref<8x32xf32, #tpu.memory_space<vmem>>, vector<1x16xf32>,
    %c4_74 = arith.constant 4 : index
    %c16_75 = arith.constant 16 : index
    %176 = vector.load %arg6[%c4_74, %c16_75] : memref<8x32xf32, #tpu.memory_space<vmem>>, vector<1x16xf32>
    %177 = vector.shape_cast %176 : vector<1x16xf32> to vector<16xf32>
    %178 = vector.shape_cast %172 : vector<16xf32> to vector<1x16xf32>
    tpu.vector_store %arg6[%c4_74, %c16_75], %178 {strides = array<i32>} : memref<8x32xf32, #tpu.memory_space<vmem>>, vector<1x16xf32>,
    %c5 = arith.constant 5 : index
    %c0_76 = arith.constant 0 : index
    %c0_77 = arith.constant 0 : index
    %179 = vector.load %arg1[%c5, %c0_76, %c0_77] : memref<8x16x32xf32, #tpu.memory_space<vmem>>, vector<1x16x32xf32>
    %180 = vector.shape_cast %179 : vector<1x16x32xf32> to vector<16x32xf32>
    %cst_78 = arith.constant dense<0.000000e+00> : vector<8x32xf32>
    %181 = tpu.matmul %0, %180, %cst_78 {dimension_numbers = #tpu.dot_dimension_numbers<[1], [0], [0], [1], [0, 0, 1, 1], [], []>} : vector<8x16xf32>, vector<16x32xf32>, vector<8x32xf32> -> vector<8x32xf32>
    %182 = vector.broadcast %1 : vector<8x1xf32> to vector<8x32xf32>
    %183 = arith.addf %181, %182 : vector<8x32xf32>
    %184 = math.tanh %183 : vector<8x32xf32>
    %cst_79 = arith.constant dense<0.000000e+00> : vector<16x32xf32>
    %185 = tpu.matmul %2, %184, %cst_79 {dimension_numbers = #tpu.dot_dimension_numbers<[1], [0], [0], [1], [0, 0, 1, 1], [], []>} : vector<16x8xf32>, vector<8x32xf32>, vector<16x32xf32> -> vector<16x32xf32>
    %186 = vector.broadcast %3 : vector<16x1xf32> to vector<16x32xf32>
    %187 = arith.addf %185, %186 : vector<16x32xf32>
    %cst_80 = arith.constant dense<0xFF800000> : vector<16xf32>
    %188 = vector.multi_reduction <maximumf>, %187, %cst_80 [1] : vector<16x32xf32> to vector<16xf32>
    %189 = vector.shape_cast %188 : vector<16xf32> to vector<16x1xf32>
    %190 = vector.broadcast %189 : vector<16x1xf32> to vector<16x32xf32>
    %191 = arith.subf %187, %190 : vector<16x32xf32>
    %192 = math.exp %191 : vector<16x32xf32>
    %193 = arith.mulf %192, %180 : vector<16x32xf32>
    %cst_81 = arith.constant dense<0.000000e+00> : vector<16xf32>
    %194 = vector.multi_reduction <add>, %192, %cst_81 [1] : vector<16x32xf32> to vector<16xf32>
    %cst_82 = arith.constant dense<0.000000e+00> : vector<16xf32>
    %195 = vector.multi_reduction <add>, %193, %cst_82 [1] : vector<16x32xf32> to vector<16xf32>
    %196 = arith.mulf %193, %180 : vector<16x32xf32>
    %cst_83 = arith.constant dense<0.000000e+00> : vector<16xf32>
    %197 = vector.multi_reduction <add>, %196, %cst_83 [1] : vector<16x32xf32> to vector<16xf32>
    %198 = tpu.reciprocal %194 {approx = true} : vector<16xf32> -> vector<16xf32>
    %199 = arith.mulf %195, %198 : vector<16xf32>
    %200 = arith.mulf %197, %198 : vector<16xf32>
    %201 = arith.mulf %199, %199 : vector<16xf32>
    %202 = arith.subf %200, %201 : vector<16xf32>
    %cst_84 = arith.constant 0.000000e+00 : f32
    %203 = vector.broadcast %cst_84 : f32 to vector<16xf32>
    %204 = arith.maximumf %202, %203 : vector<16xf32>
    %cst_85 = arith.constant 1.000000e-07 : f32
    %205 = vector.broadcast %cst_85 : f32 to vector<16xf32>
    %206 = arith.addf %204, %205 : vector<16xf32>
    %207 = math.sqrt %206 : vector<16xf32>
    %c5_86 = arith.constant 5 : index
    %c0_87 = arith.constant 0 : index
    %208 = vector.load %arg6[%c5_86, %c0_87] : memref<8x32xf32, #tpu.memory_space<vmem>>, vector<1x16xf32>
    %209 = vector.shape_cast %208 : vector<1x16xf32> to vector<16xf32>
    %210 = vector.shape_cast %199 : vector<16xf32> to vector<1x16xf32>
    tpu.vector_store %arg6[%c5_86, %c0_87], %210 {strides = array<i32>} : memref<8x32xf32, #tpu.memory_space<vmem>>, vector<1x16xf32>,
    %c5_88 = arith.constant 5 : index
    %c16_89 = arith.constant 16 : index
    %211 = vector.load %arg6[%c5_88, %c16_89] : memref<8x32xf32, #tpu.memory_space<vmem>>, vector<1x16xf32>
    %212 = vector.shape_cast %211 : vector<1x16xf32> to vector<16xf32>
    %213 = vector.shape_cast %207 : vector<16xf32> to vector<1x16xf32>
    tpu.vector_store %arg6[%c5_88, %c16_89], %213 {strides = array<i32>} : memref<8x32xf32, #tpu.memory_space<vmem>>, vector<1x16xf32>,
    %c6 = arith.constant 6 : index
    %c0_90 = arith.constant 0 : index
    %c0_91 = arith.constant 0 : index
    %214 = vector.load %arg1[%c6, %c0_90, %c0_91] : memref<8x16x32xf32, #tpu.memory_space<vmem>>, vector<1x16x32xf32>
    %215 = vector.shape_cast %214 : vector<1x16x32xf32> to vector<16x32xf32>
    %cst_92 = arith.constant dense<0.000000e+00> : vector<8x32xf32>
    %216 = tpu.matmul %0, %215, %cst_92 {dimension_numbers = #tpu.dot_dimension_numbers<[1], [0], [0], [1], [0, 0, 1, 1], [], []>} : vector<8x16xf32>, vector<16x32xf32>, vector<8x32xf32> -> vector<8x32xf32>
    %217 = vector.broadcast %1 : vector<8x1xf32> to vector<8x32xf32>
    %218 = arith.addf %216, %217 : vector<8x32xf32>
    %219 = math.tanh %218 : vector<8x32xf32>
    %cst_93 = arith.constant dense<0.000000e+00> : vector<16x32xf32>
    %220 = tpu.matmul %2, %219, %cst_93 {dimension_numbers = #tpu.dot_dimension_numbers<[1], [0], [0], [1], [0, 0, 1, 1], [], []>} : vector<16x8xf32>, vector<8x32xf32>, vector<16x32xf32> -> vector<16x32xf32>
    %221 = vector.broadcast %3 : vector<16x1xf32> to vector<16x32xf32>
    %222 = arith.addf %220, %221 : vector<16x32xf32>
    %cst_94 = arith.constant dense<0xFF800000> : vector<16xf32>
    %223 = vector.multi_reduction <maximumf>, %222, %cst_94 [1] : vector<16x32xf32> to vector<16xf32>
    %224 = vector.shape_cast %223 : vector<16xf32> to vector<16x1xf32>
    %225 = vector.broadcast %224 : vector<16x1xf32> to vector<16x32xf32>
    %226 = arith.subf %222, %225 : vector<16x32xf32>
    %227 = math.exp %226 : vector<16x32xf32>
    %228 = arith.mulf %227, %215 : vector<16x32xf32>
    %cst_95 = arith.constant dense<0.000000e+00> : vector<16xf32>
    %229 = vector.multi_reduction <add>, %227, %cst_95 [1] : vector<16x32xf32> to vector<16xf32>
    %cst_96 = arith.constant dense<0.000000e+00> : vector<16xf32>
    %230 = vector.multi_reduction <add>, %228, %cst_96 [1] : vector<16x32xf32> to vector<16xf32>
    %231 = arith.mulf %228, %215 : vector<16x32xf32>
    %cst_97 = arith.constant dense<0.000000e+00> : vector<16xf32>
    %232 = vector.multi_reduction <add>, %231, %cst_97 [1] : vector<16x32xf32> to vector<16xf32>
    %233 = tpu.reciprocal %229 {approx = true} : vector<16xf32> -> vector<16xf32>
    %234 = arith.mulf %230, %233 : vector<16xf32>
    %235 = arith.mulf %232, %233 : vector<16xf32>
    %236 = arith.mulf %234, %234 : vector<16xf32>
    %237 = arith.subf %235, %236 : vector<16xf32>
    %cst_98 = arith.constant 0.000000e+00 : f32
    %238 = vector.broadcast %cst_98 : f32 to vector<16xf32>
    %239 = arith.maximumf %237, %238 : vector<16xf32>
    %cst_99 = arith.constant 1.000000e-07 : f32
    %240 = vector.broadcast %cst_99 : f32 to vector<16xf32>
    %241 = arith.addf %239, %240 : vector<16xf32>
    %242 = math.sqrt %241 : vector<16xf32>
    %c6_100 = arith.constant 6 : index
    %c0_101 = arith.constant 0 : index
    %243 = vector.load %arg6[%c6_100, %c0_101] : memref<8x32xf32, #tpu.memory_space<vmem>>, vector<1x16xf32>
    %244 = vector.shape_cast %243 : vector<1x16xf32> to vector<16xf32>
    %245 = vector.shape_cast %234 : vector<16xf32> to vector<1x16xf32>
    tpu.vector_store %arg6[%c6_100, %c0_101], %245 {strides = array<i32>} : memref<8x32xf32, #tpu.memory_space<vmem>>, vector<1x16xf32>,
    %c6_102 = arith.constant 6 : index
    %c16_103 = arith.constant 16 : index
    %246 = vector.load %arg6[%c6_102, %c16_103] : memref<8x32xf32, #tpu.memory_space<vmem>>, vector<1x16xf32>
    %247 = vector.shape_cast %246 : vector<1x16xf32> to vector<16xf32>
    %248 = vector.shape_cast %242 : vector<16xf32> to vector<1x16xf32>
    tpu.vector_store %arg6[%c6_102, %c16_103], %248 {strides = array<i32>} : memref<8x32xf32, #tpu.memory_space<vmem>>, vector<1x16xf32>,
    %c7 = arith.constant 7 : index
    %c0_104 = arith.constant 0 : index
    %c0_105 = arith.constant 0 : index
    %249 = vector.load %arg1[%c7, %c0_104, %c0_105] : memref<8x16x32xf32, #tpu.memory_space<vmem>>, vector<1x16x32xf32>
    %250 = vector.shape_cast %249 : vector<1x16x32xf32> to vector<16x32xf32>
    %cst_106 = arith.constant dense<0.000000e+00> : vector<8x32xf32>
    %251 = tpu.matmul %0, %250, %cst_106 {dimension_numbers = #tpu.dot_dimension_numbers<[1], [0], [0], [1], [0, 0, 1, 1], [], []>} : vector<8x16xf32>, vector<16x32xf32>, vector<8x32xf32> -> vector<8x32xf32>
    %252 = vector.broadcast %1 : vector<8x1xf32> to vector<8x32xf32>
    %253 = arith.addf %251, %252 : vector<8x32xf32>
    %254 = math.tanh %253 : vector<8x32xf32>
    %cst_107 = arith.constant dense<0.000000e+00> : vector<16x32xf32>
    %255 = tpu.matmul %2, %254, %cst_107 {dimension_numbers = #tpu.dot_dimension_numbers<[1], [0], [0], [1], [0, 0, 1, 1], [], []>} : vector<16x8xf32>, vector<8x32xf32>, vector<16x32xf32> -> vector<16x32xf32>
    %256 = vector.broadcast %3 : vector<16x1xf32> to vector<16x32xf32>
    %257 = arith.addf %255, %256 : vector<16x32xf32>
    %cst_108 = arith.constant dense<0xFF800000> : vector<16xf32>
    %258 = vector.multi_reduction <maximumf>, %257, %cst_108 [1] : vector<16x32xf32> to vector<16xf32>
    %259 = vector.shape_cast %258 : vector<16xf32> to vector<16x1xf32>
    %260 = vector.broadcast %259 : vector<16x1xf32> to vector<16x32xf32>
    %261 = arith.subf %257, %260 : vector<16x32xf32>
    %262 = math.exp %261 : vector<16x32xf32>
    %263 = arith.mulf %262, %250 : vector<16x32xf32>
    %cst_109 = arith.constant dense<0.000000e+00> : vector<16xf32>
    %264 = vector.multi_reduction <add>, %262, %cst_109 [1] : vector<16x32xf32> to vector<16xf32>
    %cst_110 = arith.constant dense<0.000000e+00> : vector<16xf32>
    %265 = vector.multi_reduction <add>, %263, %cst_110 [1] : vector<16x32xf32> to vector<16xf32>
    %266 = arith.mulf %263, %250 : vector<16x32xf32>
    %cst_111 = arith.constant dense<0.000000e+00> : vector<16xf32>
    %267 = vector.multi_reduction <add>, %266, %cst_111 [1] : vector<16x32xf32> to vector<16xf32>
    %268 = tpu.reciprocal %264 {approx = true} : vector<16xf32> -> vector<16xf32>
    %269 = arith.mulf %265, %268 : vector<16xf32>
    %270 = arith.mulf %267, %268 : vector<16xf32>
    %271 = arith.mulf %269, %269 : vector<16xf32>
    %272 = arith.subf %270, %271 : vector<16xf32>
    %cst_112 = arith.constant 0.000000e+00 : f32
    %273 = vector.broadcast %cst_112 : f32 to vector<16xf32>
    %274 = arith.maximumf %272, %273 : vector<16xf32>
    %cst_113 = arith.constant 1.000000e-07 : f32
    %275 = vector.broadcast %cst_113 : f32 to vector<16xf32>
    %276 = arith.addf %274, %275 : vector<16xf32>
    %277 = math.sqrt %276 : vector<16xf32>
    %c7_114 = arith.constant 7 : index
    %c0_115 = arith.constant 0 : index
    %278 = vector.load %arg6[%c7_114, %c0_115] : memref<8x32xf32, #tpu.memory_space<vmem>>, vector<1x16xf32>
    %279 = vector.shape_cast %278 : vector<1x16xf32> to vector<16xf32>
    %280 = vector.shape_cast %269 : vector<16xf32> to vector<1x16xf32>
    tpu.vector_store %arg6[%c7_114, %c0_115], %280 {strides = array<i32>} : memref<8x32xf32, #tpu.memory_space<vmem>>, vector<1x16xf32>,
    %c7_116 = arith.constant 7 : index
    %c16_117 = arith.constant 16 : index
    %281 = vector.load %arg6[%c7_116, %c16_117] : memref<8x32xf32, #tpu.memory_space<vmem>>, vector<1x16xf32>
    %282 = vector.shape_cast %281 : vector<1x16xf32> to vector<16xf32>
    %283 = vector.shape_cast %277 : vector<16xf32> to vector<1x16xf32>
    tpu.vector_store %arg6[%c7_116, %c16_117], %283 {strides = array<i32>} : memref<8x32xf32, #tpu.memory_space<vmem>>, vector<1x16xf32>,
    return
  }
  func.func @transform_0(%arg0: i32) -> (i32, i32, i32) {
    %c0_i32 = arith.constant 0 : i32
    %c0_i32_0 = arith.constant 0 : i32
    %c0_i32_1 = arith.constant 0 : i32
    return %arg0, %c0_i32, %c0_i32_0 : i32, i32, i32
  }
  func.func @transform_1(%arg0: i32) -> (i32, i32) {
    %c0_i32 = arith.constant 0 : i32
    %c0_i32_0 = arith.constant 0 : i32
    %c0_i32_1 = arith.constant 0 : i32
    return %c0_i32, %c0_i32_0 : i32, i32
  }
  func.func @transform_2(%arg0: i32) -> (i32, i32) {
    %c0_i32 = arith.constant 0 : i32
    %c0_i32_0 = arith.constant 0 : i32
    %c0_i32_1 = arith.constant 0 : i32
    return %c0_i32, %c0_i32_0 : i32, i32
  }
  func.func @transform_3(%arg0: i32) -> (i32, i32) {
    %c0_i32 = arith.constant 0 : i32
    %c0_i32_0 = arith.constant 0 : i32
    %c0_i32_1 = arith.constant 0 : i32
    return %c0_i32, %c0_i32_0 : i32, i32
  }
  func.func @transform_4(%arg0: i32) -> (i32, i32) {
    %c0_i32 = arith.constant 0 : i32
    %c0_i32_0 = arith.constant 0 : i32
    %c0_i32_1 = arith.constant 0 : i32
    return %c0_i32, %c0_i32_0 : i32, i32
  }
  func.func @transform_5(%arg0: i32) -> (i32, i32) {
    %c0_i32 = arith.constant 0 : i32
    %c0_i32_0 = arith.constant 0 : i32
    return %arg0, %c0_i32 : i32, i32
  }
}

</mosaic_0001>

<bundles_post_ra>
// kernel: attentive_statistics_pooling.1
= control target key start
LH: loop header
LB: loop body
LE: loop exit
PB: predicated region body
PF: predicated region fallthrough
CT: control target
= control target key end

     0   :  { %10 = vsyncpa [#allocation3], 0  ;;  %s3815_s0 = inlined_call_operand.hbm [shape: f32[16,16,32], index: 0, kind: input, shape index: {}]   ;;  %s3816_s1 = inlined_call_operand.hbm [shape: f32[8,16], index: 1, kind: input, shape index: {}]   ;;  %s3817_s2 = inlined_call_operand.hbm [shape: f32[8,1], index: 2, kind: input, shape index: {}]   ;;  %s3818_s3 = inlined_call_operand.hbm [shape: f32[16,8], index: 3, kind: input, shape index: {}]   ;;  %s3819_s4 = inlined_call_operand.hbm [shape: f32[16,1], index: 4, kind: input, shape index: {}]   ;;  %s3820_s5 = inlined_call_operand.hbm [shape: f32[16,32], index: 5, kind: output, shape index: {}]  }
   0x1   :  { %12 = vsyncpa [#allocation3 + $0x1], 0 }
   0x2   :  { %13 = vsyncpa [#allocation6], 0 }
   0x3   :  { %14 = vsyncpa [#allocation9], 0 }
   0x4   :  { %15 = vsyncpa [#allocation4], 0 }
   0x5   :  { %17 = vsyncpa [#allocation4 + $0x1], 0  ;;  %s3055_s18 = smov 0   ;;  %s3057_s19 = smov 0  }
   0x6   :  { %s3059_s20 = smov 0   ;;  %s3061_s21 = smov 0  }
   0x7 LB: > { %s3076_s22 = sadd.s32 4294967295, %s3011_s21   ;;  %s2358_s23 = sadd.s32 4294967294, %s3011_s21   ;;  %s3011_s21 = sphi %s3061_s21, %s3843_s21   ;;  %s3007_s20 = sphi %s3059_s20, %s3842_s20   ;;  %s3003_s19 = sphi %s3057_s19, %s3841_s19   ;;  %s2999_s18 = sphi %s3055_s18, %s3840_s18  }
   0x8   : > { %p43_p0 = scmp.ne.s32.totalorder %s3003_s19, %s2999_s18  ;;  %p3821_p1 = scmp.eq.s32.totalorder %s3076_s22, 0 }
   0x9   : > { %p157_p3 = scmp.eq.s32.totalorder %s2358_s23, 1  ;;  %p2359_p5 = scmp.ge.s32.totalorder %s3011_s21, 1 }
   0xa   : > { %p3085_p4 = por %p3821_p1, %p43_p0  ;;  %p164_p7 = scmp.lt.s32.totalorder %s3011_s21, 3 }
   0xb   : > { %p3090_p6 = por %p157_p3, %p43_p0  ;;  %s3013_s27 = smov [#allocation5]  }
   0xc   : > { %s3824_s24 = scalar_select %p3085_p4, 1, 0 }
   0xd   : > { %s3825_s25 = scalar_select %p3090_p6, 1, 0 }
   0xe   : > { %p3095_p8 = pnand %p2359_p5, %p164_p7  ;;  %s177_s28 = sshll.u32 %s3013_s27, 4  ;;  %s178_s28 = int_to_ptr.vmem [resolvable:$true] %s177_s28 }
   0xf   : > { %s3014_s29 = smov [#allocation8]   ;;  %s3015_s7 = smov [#allocation7]  }
  0x10   : > { %s3826_s26 = scalar_select %p3095_p8, 1, 0 }
  0x11   : > { %p2608_p10 = pneg %p3095_p8  ;;  %s198_s30 = sshll.u32 %s3014_s29, 4  ;;  %s3108_s30 = int_to_ptr.vmem [resolvable:$true] %s198_s30 }
  0x12   : > { %s3110_s8 = sshll.u32 %s3015_s7, 4  ;;  %s2795_s11 = scalar_lea.hbm %s3816_s1, 128  ;;  %s189_s8 = int_to_ptr.vmem [resolvable:$true] %s3110_s8 }
  0x13   : > { %p3104_p11 = pnand %p2608_p10, %p3821_p1  ;;  %p2796_p12 = scmp.ne.s32.totalorder %s3816_s1, %s2795_s11 }
  0x14   : > { %p2802_p5 = scmp.lt.u32.totalorder %s2795_s11, %s3816_s1 }
  0x15   : > { %p3120_p13 = pneg %p3104_p11 }
  0x17   : > { %p2798_p0 = pnand %p3120_p13, %p2796_p12 }
  0x19   : > { %p2799_p3 = pneg %p2798_p0 }
  0x1b   : > { %p2804_p7 = pnand %p2802_p5, %p2799_p3 }
  0x1d   : > { %2807 = shalt.err (!%p2804_p7)
}
  0x1e   : > { %s2808_s17 = scalar_lea.vmem %s178_s28, 128  ;;  %p2816_p2 = scmp.lt.s32.totalorder %s178_s28, %s178_s28 }
  0x1f   : > { %p2809_p10 = scmp.ne.s32.totalorder %s178_s28, %s2808_s17  ;;  %p2817_p6 = scmp.lt.s32.totalorder %s2808_s17, %s2808_s17 }
  0x21   : > { %p2811_p9 = pnand %p2809_p10, %p3120_p13  ;;  %p2818_p4 = por %p2817_p6, %p2816_p2 }
  0x23   : > { %p2812_p1 = pneg %p2811_p9 }
  0x25   : > { %p2819_p8 = pnand %p2818_p4, %p2812_p1 }
  0x27   : > { %2822 = shalt.err (!%p2819_p8)
}
  0x28   : > { %2611 = dma.hbm_to_vmem [thread:$0]  (!%p3104_p11), %s3816_s1, 128, %s178_s28, [#allocation6]  }
  0x29   : > { %s2823_s9 = scalar_lea.hbm %s3818_s3, 256 }
  0x2a   : > { %p2824_p9 = scmp.ne.s32.totalorder %s3818_s3, %s2823_s9  ;;  %p2830_p1 = scmp.lt.u32.totalorder %s2823_s9, %s3818_s3 }
  0x2c   : > { %p2826_p12 = pnand %p2824_p9, %p3120_p13 }
  0x2e   : > { %p2827_p2 = pneg %p2826_p12 }
  0x30   : > { %p2832_p4 = pnand %p2830_p1, %p2827_p2 }
  0x32   : > { %2835 = shalt.err (!%p2832_p4)
}
  0x33   : > { %s2836_s28 = scalar_lea.vmem %s3108_s30, 256  ;;  %p2844_p3 = scmp.lt.s32.totalorder %s3108_s30, %s3108_s30 }
  0x34   : > { %p2837_p6 = scmp.ne.s32.totalorder %s3108_s30, %s2836_s28  ;;  %p2845_p5 = scmp.lt.s32.totalorder %s2836_s28, %s2836_s28 }
  0x36   : > { %p2839_p8 = pnand %p2837_p6, %p3120_p13  ;;  %p2846_p7 = por %p2845_p5, %p2844_p3 }
  0x38   : > { %p2840_p0 = pneg %p2839_p8 }
  0x3a   : > { %p2847_p10 = pnand %p2846_p7, %p2840_p0 }
  0x3c   : > { %2850 = shalt.err (!%p2847_p10)
}
  0x3d   : > { %s3016_s15 = smov 128   ;;  %s3017_s16 = smov 8  }
  0x3e   : > { %2617 = dma.hbm_to_vmem [thread:$0]  (!%p3104_p11), %s3818_s3, 256, %s3108_s30, [#allocation9], %s3016_s15, %s3016_s15, %s3017_s16  }
  0x3f   : > { %s2851_s7 = scalar_lea.hbm %s3817_s2, 128 }
  0x40   : > { %p2852_p9 = scmp.ne.s32.totalorder %s3817_s2, %s2851_s7  ;;  %p2858_p1 = scmp.lt.u32.totalorder %s2851_s7, %s3817_s2 }
  0x42   : > { %p2854_p12 = pnand %p2852_p9, %p3120_p13 }
  0x44   : > { %p2855_p2 = pneg %p2854_p12 }
  0x46   : > { %p2860_p4 = pnand %p2858_p1, %p2855_p2 }
  0x48   : > { %2863 = shalt.err (!%p2860_p4)
}
  0x49   : > { %s2864_s13 = scalar_lea.vmem %s189_s8, 128  ;;  %p2872_p3 = scmp.lt.s32.totalorder %s189_s8, %s189_s8 }
  0x4a   : > { %p2865_p6 = scmp.ne.s32.totalorder %s189_s8, %s2864_s13  ;;  %p2873_p5 = scmp.lt.s32.totalorder %s2864_s13, %s2864_s13 }
  0x4c   : > { %p2867_p8 = pnand %p2865_p6, %p3120_p13  ;;  %p2874_p7 = por %p2873_p5, %p2872_p3 }
  0x4e   : > { %p2868_p0 = pneg %p2867_p8 }
  0x50   : > { %p2875_p10 = pnand %p2874_p7, %p2868_p0 }
  0x52   : > { %2878 = shalt.err (!%p2875_p10)
}
  0x53   : > { %2614 = dma.hbm_to_vmem [thread:$0]  (!%p3104_p11), %s3817_s2, 128, %s189_s8, [#allocation6]  }
  0x54   : > { %s3018_s17 = smov [#allocation10]   ;;  %s2879_s7 = scalar_lea.hbm %s3819_s4, 256 }
  0x55   : > { %s211_s23 = sshll.u32 %s3018_s17, 4  ;;  %p2880_p9 = scmp.ne.s32.totalorder %s3819_s4, %s2879_s7  ;;  %s212_s23 = int_to_ptr.vmem [resolvable:$true] %s211_s23 }
  0x56   : > { %p2886_p1 = scmp.lt.u32.totalorder %s2879_s7, %s3819_s4 }
  0x57   : > { %p2882_p12 = pnand %p2880_p9, %p3120_p13 }
  0x59   : > { %p2883_p2 = pneg %p2882_p12 }
  0x5b   : > { %p2888_p4 = pnand %p2886_p1, %p2883_p2 }
  0x5d   : > { %2891 = shalt.err (!%p2888_p4)
}
  0x5e   : > { %s2892_s8 = scalar_lea.vmem %s212_s23, 256  ;;  %p2900_p3 = scmp.lt.s32.totalorder %s212_s23, %s212_s23 }
  0x5f   : > { %p2893_p6 = scmp.ne.s32.totalorder %s212_s23, %s2892_s8  ;;  %p2901_p5 = scmp.lt.s32.totalorder %s2892_s8, %s2892_s8 }
  0x61   : > { %p2895_p8 = pnand %p2893_p6, %p3120_p13  ;;  %p2902_p7 = por %p2901_p5, %p2900_p3 }
  0x63   : > { %p2896_p0 = pneg %p2895_p8 }
  0x65   : > { %p2903_p10 = pnand %p2902_p7, %p2896_p0 }
  0x67   : > { %2906 = shalt.err (!%p2903_p10)
}
  0x68   : > { %2620 = dma.hbm_to_vmem [thread:$0]  (!%p3104_p11), %s3819_s4, 256, %s212_s23, [#allocation9], %s3016_s15, %s3016_s15, %s3017_s16  }
  0x69   : > { %s3203_s14 = sadd.s32 1, %s3011_s21   ;;  %s30_s6 = sadd.s32 1, %s3007_s20 }
  0x6a   : > { %s27_s28 = ssub.s32 %s3011_s21, %s3203_s14  ;;  %p37_p13 = scmp.ne.s32.totalorder %s3007_s20, %s3003_s19 }
  0x6b   : > { %p28_p9 = scmp.eq.s32.totalorder %s27_s28, 0  ;;  %p38_p12 = scmp.eq.s32.totalorder %s3011_s21, 0 }
  0x6c   : > { %p3829_p2 = scmp.eq.s32.totalorder %s3076_s22, 1  ;;  %p2633_p4 = scmp.lt.s32.totalorder %s3011_s21, 2 }
  0x6d   : > { %s3219_s27 = scalar_select %p28_p9, %s3007_s20, %s30_s6  }
  0x6e   : > { %p3213_p1 = por %p3829_p2, %p37_p13  ;;  %p39_p6 = por %p38_p12, %p37_p13 }
  0x6f   : > { %s225_s29 = sand.u32 1, %s3007_s20   ;;  %s2419_s23 = sshll.u32 %s3011_s21, 11 }
  0x70   : > { %s2365_s7 = sshll.u32 %s225_s29, 7  ;;  %s3226_s11 = scalar_lea.hbm %s3815_s0, %s2419_s23 }
  0x71   : > { %s229_s12 = scalar_lea.vmem [#allocation2], %s2365_s7  ;;  %p3230_p11 = pnand %p2633_p4, %p39_p6 }
  0x72   : > { %s237_s8 = sshll.u32 %s229_s12, 4  ;;  %s3234_s30 = scalar_lea.sflag [#allocation3], %s225_s29  ;;  %s3228_s8 = int_to_ptr.vmem [resolvable:$true] %s237_s8 }
  0x73   : > { %s2907_s6 = scalar_lea.hbm %s3226_s11, 2048  ;;  %p2909_p0 = pneg %p3230_p11 }
  0x74   : > { %p2908_p8 = scmp.ne.s32.totalorder %s3226_s11, %s2907_s6  ;;  %s2912_s23 = scalar_lea.hbm %s3815_s0, 4096 }
  0x75   : > { %p2913_p7 = scmp.lt.u32.totalorder %s3226_s11, %s3815_s0  ;;  %p2914_p10 = scmp.lt.u32.totalorder %s2912_s23, %s2907_s6 }
  0x76   : > { %p2910_p3 = pnand %p2909_p0, %p2908_p8  ;;  %p2916_p9 = scmp.lt.u32.totalorder %s2907_s6, %s3226_s11 }
  0x77   : > { %p2915_p13 = por %p2914_p10, %p2913_p7 }
  0x78   : > { %p2911_p5 = pneg %p2910_p3 }
  0x79   : > { %p2917_p12 = por %p2916_p9, %p2915_p13 }
  0x7b   : > { %p2918_p2 = pnand %p2917_p12, %p2911_p5 }
  0x7d   : > { %2921 = shalt.err (!%p2918_p2)
}
  0x7e   : > { %s2922_s29 = scalar_lea.vmem %s3228_s8, 2048  ;;  %s3019_s12 = smov [#allocation2]  }
  0x7f   : > { %p2923_p4 = scmp.ne.s32.totalorder %s3228_s8, %s2922_s29  ;;  %s2927_s28 = sshll.u32 %s3019_s12, 4  ;;  %s2928_s28 = int_to_ptr.vmem [resolvable:$false] %s2927_s28 }
  0x80   : > { %s2929_s7 = scalar_lea.vmem %s2928_s28, 4096  ;;  %p2930_p3 = scmp.lt.s32.totalorder %s3228_s8, %s2928_s28 }
  0x81   : > { %p2925_p6 = pnand %p2923_p4, %p2909_p0  ;;  %p2931_p7 = scmp.lt.s32.totalorder %s2929_s7, %s2922_s29 }
  0x83   : > { %p2926_p8 = pneg %p2925_p6  ;;  %p2932_p10 = por %p2931_p7, %p2930_p3 }
  0x85   : > { %p2933_p13 = pnand %p2932_p10, %p2926_p8 }
  0x87   : > { %2936 = shalt.err (!%p2933_p13)
}
  0x88   : > { %2624 = dma.hbm_to_vmem [thread:$0]  (!%p3230_p11), %s3226_s11, 2048, %s3228_s8, %s3234_s30, %s3016_s15, %s3016_s15, %s3017_s16  }
  0x89   : > { %p3832_p0 = scmp.ne.s32.totalorder %s3826_s26, 0 }
  0x8a   : > { %s3268_s6 = sand.u32 (!%p3832_p0), 1, %s3003_s19   ;;  %p3833_p5 = scmp.ne.s32.totalorder (!%p3832_p0), %s3824_s24, 0 }
  0x8b   : > { %249 = sbr.rel (%p3832_p0) target bundleno = 1255 (0x4e7), region = 40  ;;  %s2370_s23 = sshll.u32 (!%p3832_p0), %s3268_s6, 7 }
  0x8c   : > { %s252_s9 = scalar_lea.sflag (!%p3832_p0), [#allocation3], %s3268_s6  ;;  %s3272_s10 = scalar_lea.vmem (!%p3832_p0), [#allocation2], %s2370_s23 }
  0x92   : > { %2982 = dma.done.wait (%p3833_p5), %s252_s9, 2048  }
  0x93   : > { %2984 = vsyncadd (%p3833_p5), %s252_s9, 4294965248  ;;  %p3834_p11 = scmp.eq.s32.totalorder %s3076_s22, 0 }
  0x95   : > { %2986 = dma.done.wait (%p3834_p11), [#allocation6], 256   ;;  %p3835_p9 = pmov %p3834_p11 }
  0x97   : > { %2988 = vsyncadd (%p3835_p9), [#allocation6], 4294967040  ;;  %p3836_p12 = pmov %p3835_p9 }
  0x98   : > { %p3837_p2 = pmov %p3835_p9 }
  0x99   : > { %2990 = dma.done.wait (%p3836_p12), [#allocation9], 512  }
  0x9a   : > { %2992 = vsyncadd (%p3837_p2), [#allocation9], 4294966784  ;;  %v3020_v0 = vmov 0.0|0.0   ;;  %vm3021_vm0 = vmmov 0   ;;  %v3022_v1 = vmov 0.0   ;;  %v3023_v2 = vmov 0  }
  0x9b   : > { %2564 = vmatprep.subr.bf16.mxu0 %v3020_v0  ;;  %2472 = vmatprep.mubr.msk.f32.mxu0 %vm3021_vm0, %v3022_v1  ;;  %v3290_v3 = vld [vmem:[%s3272_s10] sm:$0xff]  ;;  %v3293_v4 = vld [vmem:[%s3272_s10 + $0x8] sm:$0xff]  ;;  %vm312_vm1 = vcmask 130048   ;;  %v3301_v9 = vld [vmem:[#allocation8] sm:$0xff]  ;;  %vm397_vm2 = vcmask 64512   ;;  %vm479_vm3 = vcmask 261120  }
  0x9c   : > { %2681 = vset.pattern.permute.xlu0 %v3023_v2  ;;  %2682 = vset.pattern.permute.xlu1 %v3023_v2  ;;  %v2565_v5 = vpack.c.bf16 %v3293_v4, %v3290_v3  ;;  %v300_v6 = vld [vmem:[#allocation7] sm:$0xff]  ;;  %v3297_v7 = vld [vmem:[#allocation5] sm:$0xff]  ;;  %v3311_v15 = vld [vmem:[%s3272_s10 + $0x10] sm:$0xff]  ;;  %s2375_s24 = sshll.u32 %s3268_s6, 3  ;;  %vm555_vm4 = vcmask 130112   ;;  %vm558_vm5 = vcmask 122880  }
  0x9d   : > { %309 = vperm.xlu0 %2681, %v300_v6   ;;  %v303_v8 = vld [vmem:[#allocation10] sm:$0xff]  ;;  %2477 = vmatprep.mubr.msk.f32.mxu1 %vm397_vm2, %v3301_v9  ;;  %v304_v10 = vld [vmem:[#allocation10 + $0x8] sm:$0xff]  ;;  %v3314_v16 = vld [vmem:[%s3272_s10 + $0x18] sm:$0xff]  ;;  %s3600_s26 = scalar_lea.vmem [#allocation11], %s2375_s24  ;;  %vm572_vm10 = vcmask 261312   ;;  %vm575_vm11 = vcmask 254080  }
  0x9e   : > { %2566 = vmatpush3.bf16.msra.mxu0 %v2565_v5  ;;  %394 = vperm.xlu1 %2682, %v304_v10   ;;  %v3316_v18 = vld [vmem:[#allocation8 + $0x8] sm:$0xff]  ;;  %v2568_v19 = vpack.c.bf16 %v3314_v16, %v3311_v15  ;;  %v3321_v20 = vld [vmem:[%s3272_s10 + $0x20] sm:$0xff]  ;;  %v3324_v21 = vld [vmem:[%s3272_s10 + $0x28] sm:$0xff]  ;;  %s2415_s15 = sshll.u32 %s3076_s22, 7  ;;  %s2250_s16 = sshll.u32 %s3600_s26, 4  ;;  %s3770_s16 = int_to_ptr.vmem [resolvable:$true] %s2250_s16 }
  0x9f   : > { %v2571_v22 = vpack.c.bf16 %v3324_v21, %v3321_v20  ;;  %v3335_v23 = vld [vmem:[%s3272_s10 + $0x30] sm:$0xff]  ;;  %v3338_v24 = vld [vmem:[%s3272_s10 + $0x38] sm:$0xff]  ;;  %v3348_v26 = vld [vmem:[%s3272_s10 + $0x40] sm:$0xff]  ;;  %s3768_s13 = scalar_lea.hbm %s3820_s5, %s2415_s15  ;;  %s2237_s30 = scalar_lea.sflag [#allocation4], %s3268_s6 }
  0xa0   : > { %v2574_v25 = vpack.c.bf16 %v3338_v24, %v3335_v23  ;;  %v3351_v27 = vld [vmem:[%s3272_s10 + $0x48] sm:$0xff]  ;;  %v3361_v29 = vld [vmem:[%s3272_s10 + $0x50] sm:$0xff]  ;;  %v3364_v30 = vld [vmem:[%s3272_s10 + $0x58] sm:$0xff]  ;;  %s2937_s22 = scalar_lea.vmem %s3770_s16, 128  ;;  %s3024_s29 = smov [#allocation11]  }
  0xa1   : > { %2473 = vmatmul.mubr.msk.f32.vlgmr.msra.gmra.mrb[0].mxu0 %vm312_vm1, %v3297_v7  ;;  %389 = vperm.xlu0 %2681, %v303_v8   ;;  %v2577_v28 = vpack.c.bf16 %v3351_v27, %v3348_v26  ;;  %v2580_v31 = vpack.c.bf16 %v3364_v30, %v3361_v29  ;;  %v3374_v32 = vld [vmem:[%s3272_s10 + $0x60] sm:$0xff]  ;;  %v3377_v33 = vld [vmem:[%s3272_s10 + $0x68] sm:$0xff]  ;;  %v3387_v35 = vld [vmem:[%s3272_s10 + $0x70] sm:$0xff]  ;;  %p2938_p4 = scmp.ne.s32.totalorder %s3770_s16, %s2937_s22  ;;  %s2941_s12 = sshll.u32 %s3024_s29, 4  ;;  %s2942_s12 = int_to_ptr.vmem [resolvable:$false] %s2941_s12 }
  0xa2   : > { %2489 = vmatprep.mubr.msk.f32.mxu0 %vm397_vm2, %v3301_v9  ;;  %v2583_v34 = vpack.c.bf16 %v3377_v33, %v3374_v32  ;;  %v3390_v36 = vld [vmem:[%s3272_s10 + $0x78] sm:$0xff]  ;;  %s2943_s28 = scalar_lea.vmem %s2942_s12, 256  ;;  %p2944_p3 = scmp.lt.s32.totalorder %s3770_s16, %s2942_s12 }
  0xa3   : > { %v2586_v37 = vpack.c.bf16 %v3390_v36, %v3387_v35  ;;  %p2939_p6 = pnand %p2938_p4, %p3213_p1  ;;  %p2945_p7 = scmp.lt.s32.totalorder %s2943_s28, %s2937_s22 }
  0xa5   : > { %p2940_p8 = pneg %p2939_p6  ;;  %p2946_p10 = por %p2945_p7, %p2944_p3 }
  0xa7   : > { %p2947_p13 = pnand %p2946_p10, %p2940_p8 }
 0x11c   : > { %v3307_v11 = vpop.permute.xlu0 %309 }
 0x11d   : > { %v3405_v38 = vpop.permute.xlu1 %394 }
 0x120   : > { %v3407_v40 = vpop.permute.xlu0 %389 }
 0x174   : > { %v382_v12 = vpop.f32.mrb[0].mxu0 }
 0x175   : > { %v383_v13 = vadd.f32 %v382_v12, %v3307_v11  ;;  %v2474_v14 = vpop.f32.mrb[1].mxu0 }
 0x177   : > { %2683 = vtanh.f32 %v383_v13 }
 0x181   : > { %v2684_v17 = vpop.eup %2683 }
 0x182   : > { %2475 = vmatprep.subr.mxu1 %v2684_v17 }
 0x183   : > { %2476 = vmatpush3.msra.mxu1 %v2684_v17 }
 0x184   : > { %2478 = vmatmul.mubr.msk.f32.vlgmr.msra.gmra.mrb[0].mxu1 %vm397_vm2, %v3316_v18  ;;  %2567 = vmatprep.subr.bf16.mxu1 %v3020_v0 }
 0x185   : > { %2569 = vmatpush3.bf16.msra.mxu1 %v2568_v19  ;;  %2484 = vmatprep.mubr.msk.f32.mxu1 %vm3021_vm0, %v3022_v1 }
 0x186   : > { %2570 = vmatprep.subr.bf16.mxu1 %v3020_v0 }
 0x188   : > { %2485 = vmatmul.mubr.msk.f32.vlgmr.msra.gmra.mrb[2].mxu1 %vm312_vm1, %v3297_v7 }
 0x189   : > { %2572 = vmatpush3.bf16.msra.mxu1 %v2571_v22  ;;  %2496 = vmatprep.mubr.msk.f32.mxu1 %vm3021_vm0, %v3022_v1 }
 0x18a   : > { %2573 = vmatprep.subr.bf16.mxu1 %v3020_v0 }
 0x18c   : > { %2497 = vmatmul.mubr.msk.f32.vlgmr.msra.gmra.mrb[4].mxu1 %vm312_vm1, %v3297_v7 }
 0x18d   : > { %2575 = vmatpush3.bf16.msra.mxu1 %v2574_v25  ;;  %2508 = vmatprep.mubr.msk.f32.mxu1 %vm3021_vm0, %v3022_v1 }
 0x18e   : > { %2576 = vmatprep.subr.bf16.mxu1 %v3020_v0 }
 0x190   : > { %2509 = vmatmul.mubr.msk.f32.vlgmr.msra.gmra.mrb[6].mxu1 %vm312_vm1, %v3297_v7 }
 0x191   : > { %2578 = vmatpush3.bf16.msra.mxu1 %v2577_v28  ;;  %2520 = vmatprep.mubr.msk.f32.mxu1 %vm3021_vm0, %v3022_v1 }
 0x192   : > { %2579 = vmatprep.subr.bf16.mxu1 %v3020_v0 }
 0x194   : > { %2521 = vmatmul.mubr.msk.f32.vlgmr.msra.gmra.mrb[8].mxu1 %vm312_vm1, %v3297_v7 }
 0x195   : > { %2581 = vmatpush3.bf16.msra.mxu1 %v2580_v31  ;;  %2532 = vmatprep.mubr.msk.f32.mxu1 %vm3021_vm0, %v3022_v1 }
 0x196   : > { %2582 = vmatprep.subr.bf16.mxu1 %v3020_v0 }
 0x198   : > { %2533 = vmatmul.mubr.msk.f32.vlgmr.msra.gmra.mrb[10].mxu1 %vm312_vm1, %v3297_v7 }
 0x199   : > { %2584 = vmatpush3.bf16.msra.mxu1 %v2583_v34  ;;  %2544 = vmatprep.mubr.msk.f32.mxu1 %vm3021_vm0, %v3022_v1 }
 0x19a   : > { %2585 = vmatprep.subr.bf16.mxu1 %v3020_v0 }
 0x19c   : > { %2545 = vmatmul.mubr.msk.f32.vlgmr.msra.gmra.mrb[12].mxu1 %vm312_vm1, %v3297_v7 }
 0x19d   : > { %2587 = vmatpush3.bf16.msra.mxu1 %v2586_v37  ;;  %2556 = vmatprep.mubr.msk.f32.mxu1 %vm3021_vm0, %v3022_v1 }
 0x1a0   : > { %2557 = vmatmul.mubr.msk.f32.vlgmr.msra.gmra.mrb[14].mxu1 %vm312_vm1, %v3297_v7 }
 0x257   : > { %v2479_v39 = vpop.f32.mrb[0].mxu1 }
 0x258   : > { %v3410_v41 = vadd.f32 %v2479_v39, %v3405_v38  ;;  %v470_v42 = vpop.f32.mrb[1].mxu1 }
 0x259   : > { %v3413_v43 = vadd.f32 %v470_v42, %v3407_v40 }
 0x25a   : > { %v483_v44 = vsel %vm479_vm3, %v3410_v41, -inf }
 0x25b   : > { %484 = vmax.xlane.f32.xlu0 %v483_v44  ;;  %v646_v45 = vpop.f32.mrb[2].mxu1  ;;  %v480_v46 = vsel %vm479_vm3, %v3413_v43, -inf }
 0x25c   : > { %v647_v47 = vadd.f32 %v646_v45, %v3307_v11  ;;  %v2486_v48 = vpop.f32.mrb[3].mxu1  ;;  %481 = vmax.xlane.f32.xlu1 %v480_v46 }
 0x25e   : > { %2685 = vtanh.f32 %v647_v47 }
 0x25f   : > { %v883_v49 = vpop.f32.mrb[4].mxu1 }
 0x260   : > { %v884_v50 = vadd.f32 %v883_v49, %v3307_v11  ;;  %v2498_v51 = vpop.f32.mrb[5].mxu1 }
 0x262   : > { %2687 = vtanh.f32 %v884_v50 }
 0x263   : > { %v1120_v52 = vpop.f32.mrb[6].mxu1 }
 0x264   : > { %v1121_v53 = vadd.f32 %v1120_v52, %v3307_v11  ;;  %v2510_v54 = vpop.f32.mrb[7].mxu1 }
 0x266   : > { %2689 = vtanh.f32 %v1121_v53 }
 0x267   : > { %v1357_v55 = vpop.f32.mrb[8].mxu1 }
 0x268   : > { %v2686_v56 = vpop.eup %2685  ;;  %v1358_v57 = vadd.f32 %v1357_v55, %v3307_v11  ;;  %v2522_v58 = vpop.f32.mrb[9].mxu1 }
 0x269   : > { %2487 = vmatprep.subr.mxu0 %v2686_v56 }
 0x26a   : > { %2691 = vtanh.f32 %v1358_v57  ;;  %2488 = vmatpush3.msra.mxu0 %v2686_v56 }
 0x26b   : > { %2490 = vmatmul.mubr.msk.f32.vlgmr.msra.gmra.mrb[2].mxu0 %vm397_vm2, %v3316_v18  ;;  %v1594_v59 = vpop.f32.mrb[10].mxu1 }
 0x26c   : > { %v2688_v60 = vpop.eup %2687  ;;  %v1595_v61 = vadd.f32 %v1594_v59, %v3307_v11  ;;  %2501 = vmatprep.mubr.msk.f32.mxu0 %vm397_vm2, %v3301_v9  ;;  %v2534_v62 = vpop.f32.mrb[11].mxu1 }
 0x26d   : > { %2499 = vmatprep.subr.mxu0 %v2688_v60 }
 0x26e   : > { %2693 = vtanh.f32 %v1595_v61  ;;  %2500 = vmatpush3.msra.mxu0 %v2688_v60 }
 0x26f   : > { %2502 = vmatmul.mubr.msk.f32.vlgmr.msra.gmra.mrb[4].mxu0 %vm397_vm2, %v3316_v18  ;;  %v1831_v63 = vpop.f32.mrb[12].mxu1 }
 0x270   : > { %v2690_v0 = vpop.eup %2689  ;;  %v1832_v1 = vadd.f32 %v1831_v63, %v3307_v11  ;;  %2513 = vmatprep.mubr.msk.f32.mxu0 %vm397_vm2, %v3301_v9  ;;  %v2546_v2 = vpop.f32.mrb[13].mxu1 }
 0x271   : > { %2511 = vmatprep.subr.mxu0 %v2690_v0 }
 0x272   : > { %2695 = vtanh.f32 %v1832_v1  ;;  %2512 = vmatpush3.msra.mxu0 %v2690_v0 }
 0x273   : > { %2514 = vmatmul.mubr.msk.f32.vlgmr.msra.gmra.mrb[6].mxu0 %vm397_vm2, %v3316_v18  ;;  %v2068_v5 = vpop.f32.mrb[14].mxu1 }
 0x274   : > { %v2692_v6 = vpop.eup %2691  ;;  %v2069_v7 = vadd.f32 %v2068_v5, %v3307_v11  ;;  %2525 = vmatprep.mubr.msk.f32.mxu0 %vm397_vm2, %v3301_v9  ;;  %v2558_v8 = vpop.f32.mrb[15].mxu1 }
 0x275   : > { %2523 = vmatprep.subr.mxu0 %v2692_v6 }
 0x276   : > { %2697 = vtanh.f32 %v2069_v7  ;;  %2524 = vmatpush3.msra.mxu0 %v2692_v6 }
 0x277   : > { %2526 = vmatmul.mubr.msk.f32.vlgmr.msra.gmra.mrb[8].mxu0 %vm397_vm2, %v3316_v18 }
 0x278   : > { %v2694_v10 = vpop.eup %2693  ;;  %2537 = vmatprep.mubr.msk.f32.mxu0 %vm397_vm2, %v3301_v9 }
 0x279   : > { %2535 = vmatprep.subr.mxu0 %v2694_v10 }
 0x27a   : > { %2536 = vmatpush3.msra.mxu0 %v2694_v10 }
 0x27b   : > { %2538 = vmatmul.mubr.msk.f32.vlgmr.msra.gmra.mrb[10].mxu0 %vm397_vm2, %v3316_v18 }
 0x27c   : > { %v2696_v11 = vpop.eup %2695  ;;  %2549 = vmatprep.mubr.msk.f32.mxu0 %vm397_vm2, %v3301_v9 }
 0x27d   : > { %2547 = vmatprep.subr.mxu0 %v2696_v11 }
 0x27e   : > { %2548 = vmatpush3.msra.mxu0 %v2696_v11 }
 0x27f   : > { %2550 = vmatmul.mubr.msk.f32.vlgmr.msra.gmra.mrb[12].mxu0 %vm397_vm2, %v3316_v18 }
 0x280   : > { %v2698_v12 = vpop.eup %2697  ;;  %2561 = vmatprep.mubr.msk.f32.mxu0 %vm397_vm2, %v3301_v9 }
 0x281   : > { %2559 = vmatprep.subr.mxu0 %v2698_v12 }
 0x282   : > { %2560 = vmatpush3.msra.mxu0 %v2698_v12 }
 0x283   : > { %2562 = vmatmul.mubr.msk.f32.vlgmr.msra.gmra.mrb[14].mxu0 %vm397_vm2, %v3316_v18 }
 0x2e8   : > { %v485_v34 = vpop.xlane.xlu0 %484 }
 0x2e9   : > { %v482_v39 = vpop.xlane.xlu1 %481  ;;  %v487_v47 = vsub.f32 %v3410_v41, %v485_v34 }
 0x2ea   : > { %v486_v49 = vsub.f32 %v3413_v43, %v482_v39 }
 0x2eb   : > { %v490_v55 = vmul.f32 1.442695, %v487_v47 }
 0x2ec   : > { %v488_v56 = vmul.f32 1.442695, %v486_v49 }
 0x2ed   : > { %2699 = vpow2.f32 %v490_v55 }
 0x2ee   : > { %2701 = vpow2.f32 %v488_v56 }
 0x33e   : > { %v2491_v13 = vpop.f32.mrb[2].mxu0 }
 0x33f   : > { %v3453_v14 = vadd.f32 %v2491_v13, %v3405_v38  ;;  %v717_v17 = vpop.f32.mrb[3].mxu0 }
 0x340   : > { %v3456_v19 = vadd.f32 %v717_v17, %v3407_v40  ;;  %v2700_v17 = vpop.eup %2699 }
 0x341   : > { %v729_v22 = vsel %vm479_vm3, %v3453_v14, -inf }
 0x342   : > { %730 = vmax.xlane.f32.xlu1 %v729_v22  ;;  %v2503_v25 = vpop.f32.mrb[4].mxu0  ;;  %v726_v9 = vsel %vm479_vm3, %v3456_v19, -inf }
 0x343   : > { %v3463_v28 = vadd.f32 %v2503_v25, %v3405_v38  ;;  %v954_v18 = vpop.f32.mrb[5].mxu0  ;;  %727 = vmax.xlane.f32.xlu0 %v726_v9  ;;  %v2702_v25 = vpop.eup %2701  ;;  %v497_v9 = vsel %vm479_vm3, %v2700_v17, 0.0 }
 0x344   : > { %v3466_v31 = vadd.f32 %v954_v18, %v3407_v40  ;;  %v494_v18 = vsel %vm479_vm3, %v2702_v25, 0.0 }
 0x345   : > { %v966_v37 = vsel %vm479_vm3, %v3463_v28, -inf }
 0x346   : > { %967 = vmax.xlane.f32.xlu1 %v966_v37  ;;  %v2515_v42 = vpop.f32.mrb[6].mxu0  ;;  %v963_v44 = vsel %vm479_vm3, %v3466_v31, -inf }
 0x347   : > { %v3473_v45 = vadd.f32 %v2515_v42, %v3405_v38  ;;  %v1191_v46 = vpop.f32.mrb[7].mxu0  ;;  %964 = vmax.xlane.f32.xlu0 %v963_v44 }
 0x348   : > { %v3477_v48 = vadd.f32 %v1191_v46, %v3407_v40 }
 0x349   : > { %v1203_v50 = vsel %vm479_vm3, %v3473_v45, -inf }
 0x34a   : > { %1204 = vmax.xlane.f32.xlu1 %v1203_v50  ;;  %v2527_v51 = vpop.f32.mrb[8].mxu0  ;;  %v1200_v52 = vsel %vm479_vm3, %v3477_v48, -inf }
 0x34b   : > { %v3485_v53 = vadd.f32 %v2527_v51, %v3405_v38  ;;  %v1428_v54 = vpop.f32.mrb[9].mxu0  ;;  %1201 = vmax.xlane.f32.xlu0 %v1200_v52 }
 0x34c   : > { %v3488_v41 = vadd.f32 %v1428_v54, %v3407_v40 }
 0x34d   : > { %v1440_v43 = vsel %vm479_vm3, %v3485_v53, -inf }
 0x34e   : > { %1441 = vmax.xlane.f32.xlu1 %v1440_v43  ;;  %v2539_v57 = vpop.f32.mrb[10].mxu0  ;;  %v1437_v58 = vsel %vm479_vm3, %v3488_v41, -inf }
 0x34f   : > { %v3495_v59 = vadd.f32 %v2539_v57, %v3405_v38  ;;  %v1665_v60 = vpop.f32.mrb[11].mxu0  ;;  %1438 = vmax.xlane.f32.xlu0 %v1437_v58 }
 0x350   : > { %v3498_v61 = vadd.f32 %v1665_v60, %v3407_v40 }
 0x351   : > { %v1677_v62 = vsel %vm479_vm3, %v3495_v59, -inf }
 0x352   : > { %1678 = vmax.xlane.f32.xlu1 %v1677_v62  ;;  %v2551_v63 = vpop.f32.mrb[12].mxu0  ;;  %v1674_v0 = vsel %vm479_vm3, %v3498_v61, -inf }
 0x353   : > { %v3505_v1 = vadd.f32 %v2551_v63, %v3405_v38  ;;  %v1902_v2 = vpop.f32.mrb[13].mxu0  ;;  %1675 = vmax.xlane.f32.xlu0 %v1674_v0 }
 0x354   : > { %v3508_v5 = vadd.f32 %v1902_v2, %v3407_v40 }
 0x355   : > { %v1914_v6 = vsel %vm479_vm3, %v3505_v1, -inf }
 0x356   : > { %1915 = vmax.xlane.f32.xlu1 %v1914_v6  ;;  %v2563_v7 = vpop.f32.mrb[14].mxu0  ;;  %v1911_v8 = vsel %vm479_vm3, %v3508_v5, -inf }
 0x357   : > { %v3515_v10 = vadd.f32 %v2563_v7, %v3405_v38  ;;  %v2139_v11 = vpop.f32.mrb[15].mxu0  ;;  %1912 = vmax.xlane.f32.xlu0 %v1911_v8  ;;  %v493_v38 = vmul.f32 %v2700_v17, %v3293_v4 }
 0x358   : > { %v3518_v12 = vadd.f32 %v2139_v11, %v3407_v40  ;;  %v492_v40 = vmul.f32 %v2702_v25, %v3290_v3 }
 0x359   : > { %v2151_v13 = vsel %vm479_vm3, %v3515_v10, -inf  ;;  %v503_v34 = vsel %vm479_vm3, %v493_v38, 0.0  ;;  %v507_v37 = vmul.f32 %v493_v38, %v3293_v4 }
 0x35a   : > { %2152 = vmax.xlane.f32.xlu1 %v2151_v13  ;;  %v2148_v22 = vsel %vm479_vm3, %v3518_v12, -inf  ;;  %v500_v39 = vsel %vm479_vm3, %v492_v40, 0.0  ;;  %v506_v42 = vmul.f32 %v492_v40, %v3290_v3 }
 0x35b   : > { %2149 = vmax.xlane.f32.xlu0 %v2148_v22  ;;  %v511_v44 = vsel %vm479_vm3, %v507_v37, 0.0 }
 0x35c   : > { %v508_v46 = vsel %vm479_vm3, %v506_v42, 0.0 }
 0x35e   : > { %498 = vadd.xlane.f32.xlu1 %v497_v9 }
 0x35f   : > { %495 = vadd.xlane.f32.xlu0 %v494_v18 }
 0x362   : > { %504 = vadd.xlane.f32.xlu1 %v503_v34 }
 0x363   : > { %501 = vadd.xlane.f32.xlu0 %v500_v39 }
 0x366   : > { %512 = vadd.xlane.f32.xlu1 %v511_v44 }
 0x367   : > { %509 = vadd.xlane.f32.xlu0 %v508_v46 }
 0x3cf   : > { %v731_v47 = vpop.xlane.xlu1 %730 }
 0x3d0   : > { %v733_v49 = vsub.f32 %v3453_v14, %v731_v47  ;;  %v728_v50 = vpop.xlane.xlu0 %727 }
 0x3d1   : > { %v732_v51 = vsub.f32 %v3456_v19, %v728_v50  ;;  %v544_v50 = vlaneseq }
 0x3d2   : > { %v736_v52 = vmul.f32 1.442695, %v733_v49 }
 0x3d3   : > { %v734_v4 = vmul.f32 1.442695, %v732_v51  ;;  %v968_v54 = vpop.xlane.xlu1 %967 }
 0x3d4   : > { %2703 = vpow2.f32 %v736_v52  ;;  %v970_v55 = vsub.f32 %v3463_v28, %v968_v54  ;;  %v965_v3 = vpop.xlane.xlu0 %964 }
 0x3d5   : > { %2705 = vpow2.f32 %v734_v4  ;;  %v969_v56 = vsub.f32 %v3466_v31, %v965_v3 }
 0x3d6   : > { %v973_v43 = vmul.f32 1.442695, %v970_v55 }
 0x3d7   : > { %v971_v57 = vmul.f32 1.442695, %v969_v56  ;;  %v1205_v58 = vpop.xlane.xlu1 %1204 }
 0x3d8   : > { %v1202_v60 = vpop.xlane.xlu0 %1201  ;;  %2707 = vpow2.f32 %v973_v43  ;;  %v1207_v19 = vsub.f32 %v3473_v45, %v1205_v58  ;;  %v3572_v43 = vshrl.u32 %v544_v50, 7 }
 0x3d9   : > { %2709 = vpow2.f32 %v971_v57  ;;  %v1206_v2 = vsub.f32 %v3477_v48, %v1202_v60 }
 0x3da   : > { %v1210_v13 = vmul.f32 1.442695, %v1207_v19 }
 0x3db   : > { %v1442_v14 = vpop.xlane.xlu1 %1441  ;;  %v1208_v17 = vmul.f32 1.442695, %v1206_v2 }
 0x3dc   : > { %v1439_v62 = vpop.xlane.xlu0 %1438  ;;  %2711 = vpow2.f32 %v1210_v13  ;;  %v1444_v44 = vsub.f32 %v3485_v53, %v1442_v14  ;;  %v3568_v53 = vand.u32 127, %v544_v50 }
 0x3dd   : > { %2713 = vpow2.f32 %v1208_v17  ;;  %v1443_v46 = vsub.f32 %v3488_v41, %v1439_v62 }
 0x3de   : > { %v2704_v63 = vpop.eup %2703  ;;  %v1447_v54 = vmul.f32 1.442695, %v1444_v44  ;;  %v550_v57 = vadd.s32 4294967288, %v3568_v53 }
 0x3df   : > { %v2706_v0 = vpop.eup %2705  ;;  %v3540_v6 = vpop.xlane.xlu1 %1678  ;;  %v743_v28 = vsel %vm479_vm3, %v2704_v63, 0.0  ;;  %v739_v31 = vmul.f32 %v2704_v63, %v3314_v16 }
 0x3e0   : > { %744 = vadd.xlane.f32.xlu1 %v743_v28  ;;  %v3544_v7 = vpop.xlane.xlu0 %1675  ;;  %v740_v8 = vsel %vm479_vm3, %v2706_v0, 0.0  ;;  %v738_v11 = vmul.f32 %v2706_v0, %v3311_v15  ;;  %v1681_v0 = vsub.f32 %v3495_v59, %v3540_v6  ;;  %v3584_v28 = vsub.s32 %v550_v57, %v3572_v43 }
 0x3e1   : > { %741 = vadd.xlane.f32.xlu0 %v740_v8  ;;  %v749_v48 = vsel %vm479_vm3, %v739_v31, 0.0  ;;  %v753_v34 = vmul.f32 %v3314_v16, %v739_v31  ;;  %v1680_v2 = vsub.f32 %v3498_v61, %v3544_v7 }
 0x3e2   : > { %v2708_v22 = vpop.eup %2707  ;;  %v746_v9 = vsel %vm479_vm3, %v738_v11, 0.0  ;;  %v752_v42 = vmul.f32 %v3311_v15, %v738_v11  ;;  %v1445_v15 = vmul.f32 1.442695, %v1443_v46  ;;  %v3590_v11 = vsub.s32 %v3568_v53, %v3572_v43 }
 0x3e3   : > { %v3548_v45 = vpop.xlane.xlu1 %1915  ;;  %v2710_v38 = vpop.eup %2709  ;;  %v980_v40 = vsel %vm479_vm3, %v2708_v22, 0.0  ;;  %v757_v49 = vsel %vm479_vm3, %v753_v34, 0.0  ;;  %v976_v51 = vmul.f32 %v2708_v22, %v3324_v21  ;;  %v1684_v61 = vmul.f32 1.442695, %v1681_v0 }
 0x3e4   : > { %750 = vadd.xlane.f32.xlu1 %v749_v48  ;;  %v3551_v25 = vpop.xlane.xlu0 %1912  ;;  %v977_v39 = vsel %vm479_vm3, %v2710_v38, 0.0  ;;  %v754_v52 = vsel %vm479_vm3, %v752_v42, 0.0  ;;  %v975_v4 = vmul.f32 %v2710_v38, %v3321_v20  ;;  %v1682_v7 = vmul.f32 1.442695, %v1680_v2 }
 0x3e5   : > { %747 = vadd.xlane.f32.xlu0 %v746_v9  ;;  %v986_v41 = vsel %vm479_vm3, %v976_v51, 0.0  ;;  %v990_v60 = vmul.f32 %v3324_v21, %v976_v51  ;;  %v567_v2 = vadd.s32 4294967272, %v3568_v53 }
 0x3e6   : > { %v2712_v55 = vpop.eup %2711  ;;  %v983_v3 = vsel %vm479_vm3, %v975_v4, 0.0  ;;  %v989_v63 = vmul.f32 %v3321_v20, %v975_v4 }
 0x3e7   : > { %v3554_v18 = vpop.xlane.xlu1 %2152  ;;  %v2714_v56 = vpop.eup %2713  ;;  %v1217_v58 = vsel %vm479_vm3, %v2712_v55, 0.0  ;;  %v994_v21 = vsel %vm479_vm3, %v990_v60, 0.0  ;;  %v1213_v31 = vmul.f32 %v2712_v55, %v3338_v24 }
 0x3e8   : > { %981 = vadd.xlane.f32.xlu1 %v980_v40  ;;  %v3558_v37 = vpop.xlane.xlu0 %2149  ;;  %v1214_v62 = vsel %vm479_vm3, %v2714_v56, 0.0  ;;  %v991_v20 = vsel %vm479_vm3, %v989_v63, 0.0  ;;  %v1212_v59 = vmul.f32 %v2714_v56, %v3335_v23  ;;  %v1918_v56 = vsub.f32 %v3505_v1, %v3548_v45 }
 0x3e9   : > { %978 = vadd.xlane.f32.xlu0 %v977_v39  ;;  %v1223_v34 = vsel %vm479_vm3, %v1213_v31, 0.0  ;;  %v2154_v0 = vsub.f32 %v3518_v12, %v3558_v37  ;;  %v3629_v12 = vsub.s32 %v567_v2, %v3572_v43 }
 0x3ea   : > { %v1226_v55 = vmul.f32 %v3335_v23, %v1212_v59 }
 0x3eb   : > { %v499_v47 = vpop.xlane.xlu1 %498 }
 0x3ec   : > { %758 = vadd.xlane.f32.xlu1 %v757_v49  ;;  %v496_v16 = vpop.xlane.xlu0 %495  ;;  %2715 = vrcp.f32 %v499_v47  ;;  %v1220_v47 = vsel %vm479_vm3, %v1212_v59, 0.0 }
 0x3ed   : > { %755 = vadd.xlane.f32.xlu0 %v754_v52  ;;  %2717 = vrcp.f32 %v496_v16 }
 0x3ee   : > { %2719 = vpow2.f32 %v1447_v54  ;;  %v1227_v54 = vmul.f32 %v3338_v24, %v1213_v31 }
 0x3ef   : > { %2721 = vpow2.f32 %v1445_v15  ;;  %v505_v14 = vpop.xlane.xlu1 %504 }
 0x3f0   : > { %987 = vadd.xlane.f32.xlu1 %v986_v41  ;;  %v502_v19 = vpop.xlane.xlu0 %501  ;;  %2723 = vpow2.f32 %v1684_v61  ;;  %v1231_v60 = vsel %vm479_vm3, %v1227_v54, 0.0 }
 0x3f1   : > { %984 = vadd.xlane.f32.xlu0 %v983_v3  ;;  %2725 = vpow2.f32 %v1682_v7 }
 0x3f3   : > { %v513_v48 = vpop.xlane.xlu1 %512 }
 0x3f4   : > { %1218 = vadd.xlane.f32.xlu1 %v1217_v58  ;;  %v510_v40 = vpop.xlane.xlu0 %509  ;;  %v1917_v58 = vsub.f32 %v3508_v5, %v3551_v25 }
 0x3f5   : > { %1215 = vadd.xlane.f32.xlu0 %v1214_v62  ;;  %v1921_v62 = vmul.f32 1.442695, %v1918_v56 }
 0x3f6   : > { %v2716_v8 = vpop.eup %2715  ;;  %v1919_v63 = vmul.f32 1.442695, %v1917_v58 }
 0x3f7   : > { %v2718_v6 = vpop.eup %2717  ;;  %v517_v13 = vmul.f32 %v2716_v8, %v505_v14  ;;  %v519_v38 = vmul.f32 %v2716_v8, %v513_v48  ;;  %v1228_v14 = vsel %vm479_vm3, %v1226_v55, 0.0 }
 0x3f8   : > { %995 = vadd.xlane.f32.xlu1 %v994_v21  ;;  %v516_v17 = vmul.f32 %v2718_v6, %v502_v19  ;;  %v2720_v39 = vpop.eup %2719  ;;  %v518_v46 = vmul.f32 %v2718_v6, %v510_v40  ;;  %v2155_v19 = vsub.f32 %v3515_v10, %v3554_v18  ;;  %v562_v21 = vadd.s32 4294967280, %v3568_v53 }
 0x3f9   : > { %992 = vadd.xlane.f32.xlu0 %v991_v20  ;;  %v521_v22 = vmul.f32 %v517_v13, %v517_v13  ;;  %v554_v9 = vrot.slane %v517_v13, %v3584_v28  ;;  %v2722_v49 = vpop.eup %2721  ;;  %v1454_v4 = vsel %vm479_vm3, %v2720_v39, 0.0  ;;  %v1450_v24 = vmul.f32 %v2720_v39, %v3351_v27 }
 0x3fa   : > { %v520_v42 = vmul.f32 %v516_v17, %v516_v17  ;;  %v549_v44 = vrot.slane %v516_v17, %v3590_v11  ;;  %v1451_v41 = vsel %vm479_vm3, %v2722_v49, 0.0  ;;  %v1449_v23 = vmul.f32 %v2722_v49, %v3348_v26  ;;  %v2724_v45 = vpop.eup %2723 }
 0x3fb   : > { %v523_v50 = vsub.f32 %v519_v38, %v521_v22  ;;  %v1460_v1 = vsel %vm479_vm3, %v1450_v24, 0.0  ;;  %v2726_v25 = vpop.eup %2725  ;;  %v1464_v31 = vmul.f32 %v3351_v27, %v1450_v24  ;;  %v1691_v8 = vsel %vm479_vm3, %v2724_v45, 0.0 }
 0x3fc   : > { %1224 = vadd.xlane.f32.xlu1 %v1223_v34  ;;  %v556_v51 = vsel %vm555_vm4, %v554_v9, %v549_v44  ;;  %v522_v16 = vsub.f32 %v518_v46, %v520_v42  ;;  %v1457_v5 = vsel %vm479_vm3, %v1449_v23, 0.0  ;;  %v1463_v20 = vmul.f32 %v3348_v26, %v1449_v23 }
 0x3fd   : > { %1221 = vadd.xlane.f32.xlu0 %v1220_v47  ;;  %559 = vst.msk [vmem:[%s3600_s26] sm:$0x1] %vm558_vm5, %v556_v51  ;;  %v525_v52 = vmax.f32 %v523_v50, 0.0  ;;  %v1688_v59 = vsel %vm479_vm3, %v2726_v25, 0.0  ;;  %v2158_v18 = vmul.f32 1.442695, %v2155_v19  ;;  %v3632_v37 = vsub.s32 %v562_v21, %v3572_v43 }
 0x3fe   : > { %v524_v15 = vmax.f32 %v522_v16, 0.0  ;;  %v2156_v6 = vmul.f32 1.442695, %v2154_v0  ;;  %v1468_v13 = vsel %vm479_vm3, %v1464_v31, 0.0  ;;  %v1687_v61 = vmul.f32 %v2724_v45, %v3364_v30 }
 0x3ff   : > { %v527_v3 = vadd.f32 1e-07, %v525_v52  ;;  %v1686_v26 = vmul.f32 %v2726_v25, %v3361_v29  ;;  %v1465_v48 = vsel %vm479_vm3, %v1463_v20, 0.0 }
 0x400   : > { %1455 = vadd.xlane.f32.xlu1 %v1454_v4  ;;  %v526_v57 = vadd.f32 1e-07, %v524_v15  ;;  %v1697_v42 = vsel %vm479_vm3, %v1687_v61, 0.0 }
 0x401   : > { %1452 = vadd.xlane.f32.xlu0 %v1451_v41  ;;  %2727 = vrsqrt.f32 %v527_v3  ;;  %vm537_vm6 = vcmp.eq.f32.partialorder %v527_v3, inf  ;;  %v540_v7 = vand.u32 2147483648, %v527_v3  ;;  %vm539_vm7 = vcmp.eq.f32.partialorder %v527_v3, 0.0 }
 0x402   : > { %2729 = vrsqrt.f32 %v526_v57  ;;  %vm530_vm8 = vcmp.eq.f32.partialorder %v526_v57, inf  ;;  %v533_v9 = vand.u32 2147483648, %v526_v57  ;;  %vm532_vm9 = vcmp.eq.f32.partialorder %v526_v57, 0.0 }
 0x403   : > { %2731 = vpow2.f32 %v1921_v62  ;;  %v1694_v46 = vsel %vm479_vm3, %v1686_v26, 0.0 }
 0x404   : > { %1232 = vadd.xlane.f32.xlu1 %v1231_v60  ;;  %2733 = vpow2.f32 %v1919_v63 }
 0x405   : > { %1229 = vadd.xlane.f32.xlu0 %v1228_v14  ;;  %2735 = vpow2.f32 %v2158_v18 }
 0x406   : > { %2737 = vpow2.f32 %v2156_v6 }
 0x408   : > { %1461 = vadd.xlane.f32.xlu1 %v1460_v1 }
 0x409   : > { %1458 = vadd.xlane.f32.xlu0 %v1457_v5 }
 0x40b   : > { %v2728_v10 = vpop.eup %2727 }
 0x40c   : > { %1692 = vadd.xlane.f32.xlu1 %v1691_v8  ;;  %v2730_v53 = vpop.eup %2729  ;;  %v536_v27 = vmul.f32 %v2728_v10, %v527_v3 }
 0x40d   : > { %1689 = vadd.xlane.f32.xlu0 %v1688_v59  ;;  %v529_v17 = vmul.f32 %v2730_v53, %v526_v57  ;;  %v2732_v44 = vpop.eup %2731 }
 0x40e   : > { %v538_v22 = vsel %vm537_vm6, %v527_v3, %v536_v27  ;;  %v2734_v47 = vpop.eup %2733  ;;  %v1928_v50 = vsel %vm479_vm3, %v2732_v44, 0.0  ;;  %v1924_v51 = vmul.f32 %v2732_v44, %v3377_v33  ;;  %v1701_v3 = vmul.f32 %v3364_v30, %v1687_v61 }
 0x40f   : > { %v541_v43 = vsel %vm539_vm7, %v540_v7, %v538_v22  ;;  %v531_v38 = vsel %vm530_vm8, %v526_v57, %v529_v17  ;;  %v1925_v16 = vsel %vm479_vm3, %v2734_v47, 0.0  ;;  %v1923_v52 = vmul.f32 %v2734_v47, %v3374_v32  ;;  %v2736_v54 = vpop.eup %2735 }
 0x410   : > { %1469 = vadd.xlane.f32.xlu1 %v1468_v13  ;;  %v571_v40 = vrot.slane %v541_v43, %v3629_v12  ;;  %v534_v34 = vsel %vm532_vm9, %v533_v9, %v531_v38  ;;  %v1934_v4 = vsel %vm479_vm3, %v1924_v51, 0.0  ;;  %v2738_v41 = vpop.eup %2737  ;;  %v2165_v55 = vsel %vm479_vm3, %v2736_v54, 0.0 }
 0x411   : > { %1466 = vadd.xlane.f32.xlu0 %v1465_v48  ;;  %v566_v39 = vrot.slane %v534_v34, %v3632_v37  ;;  %v1931_v15 = vsel %vm479_vm3, %v1923_v52, 0.0  ;;  %v2162_v56 = vsel %vm479_vm3, %v2738_v41, 0.0  ;;  %v1700_v57 = vmul.f32 %v3361_v29, %v1686_v26 }
 0x412   : > { %v1705_v58 = vsel %vm479_vm3, %v1701_v3, 0.0  ;;  %v1938_v60 = vmul.f32 %v3377_v33, %v1924_v51  ;;  %v1937_v14 = vmul.f32 %v3374_v32, %v1923_v52  ;;  %v2161_v30 = vmul.f32 %v2736_v54, %v3390_v36 }
 0x413   : > { %v573_v49 = vsel %vm572_vm10, %v571_v40, %v566_v39  ;;  %v1702_v24 = vsel %vm479_vm3, %v1700_v57, 0.0  ;;  %v2160_v29 = vmul.f32 %v2738_v41, %v3387_v35 }
 0x414   : > { %1698 = vadd.xlane.f32.xlu1 %v1697_v42  ;;  %576 = vst.msk [vmem:[%s3600_s26] sm:$0x1] %vm575_vm11, %v573_v49  ;;  %v1942_v23 = vsel %vm479_vm3, %v1938_v60, 0.0  ;;  %v1939_v62 = vsel %vm479_vm3, %v1937_v14, 0.0  ;;  %v2171_v63 = vsel %vm479_vm3, %v2161_v30, 0.0  ;;  %v2175_v33 = vmul.f32 %v3390_v36, %v2161_v30 }
 0x415   : > { %1695 = vadd.xlane.f32.xlu0 %v1694_v46  ;;  %v2168_v1 = vsel %vm479_vm3, %v2160_v29, 0.0  ;;  %v2174_v32 = vmul.f32 %v3387_v35, %v2160_v29 }
 0x416   : > { %v2179_v45 = vsel %vm479_vm3, %v2175_v33, 0.0 }
 0x417   : > { %v2176_v5 = vsel %vm479_vm3, %v2174_v32, 0.0 }
 0x418   : > { %1929 = vadd.xlane.f32.xlu1 %v1928_v50 }
 0x419   : > { %1926 = vadd.xlane.f32.xlu0 %v1925_v16 }
 0x41c   : > { %1935 = vadd.xlane.f32.xlu1 %v1934_v4 }
 0x41d   : > { %1932 = vadd.xlane.f32.xlu0 %v1931_v15 }
 0x420   : > { %2166 = vadd.xlane.f32.xlu1 %v2165_v55 }
 0x421   : > { %2163 = vadd.xlane.f32.xlu0 %v2162_v56 }
 0x424   : > { %1706 = vadd.xlane.f32.xlu1 %v1705_v58 }
 0x425   : > { %1703 = vadd.xlane.f32.xlu0 %v1702_v24 }
 0x428   : > { %1943 = vadd.xlane.f32.xlu1 %v1942_v23 }
 0x429   : > { %1940 = vadd.xlane.f32.xlu0 %v1939_v62 }
 0x42c   : > { %2172 = vadd.xlane.f32.xlu1 %v2171_v63 }
 0x42d   : > { %2169 = vadd.xlane.f32.xlu0 %v2168_v1 }
 0x430   : > { %2180 = vadd.xlane.f32.xlu1 %v2179_v45 }
 0x431   : > { %2177 = vadd.xlane.f32.xlu0 %v2176_v5 }
 0x46d   : > { %v745_v25 = vpop.xlane.xlu1 %744 }
 0x46e   : > { %2739 = vrcp.f32 %v745_v25  ;;  %v742_v19 = vpop.xlane.xlu0 %741 }
 0x46f   : > { %2741 = vrcp.f32 %v742_v19 }
 0x471   : > { %v751_v0 = vpop.xlane.xlu1 %750 }
 0x472   : > { %v748_v2 = vpop.xlane.xlu0 %747 }
 0x475   : > { %v982_v21 = vpop.xlane.xlu1 %981 }
 0x476   : > { %2743 = vrcp.f32 %v982_v21  ;;  %v979_v36 = vpop.xlane.xlu0 %978 }
 0x477   : > { %2745 = vrcp.f32 %v979_v36 }
 0x478   : > { %v2740_v31 = vpop.eup %2739 }
 0x479   : > { %v2742_v8 = vpop.eup %2741  ;;  %v763_v35 = vmul.f32 %v2740_v31, %v751_v0  ;;  %v759_v20 = vpop.xlane.xlu1 %758 }
 0x47a   : > { %v762_v59 = vmul.f32 %v2742_v8, %v748_v2  ;;  %v765_v10 = vmul.f32 %v2740_v31, %v759_v20  ;;  %v756_v18 = vpop.xlane.xlu0 %755 }
 0x47b   : > { %v767_v6 = vmul.f32 %v763_v35, %v763_v35  ;;  %v797_v53 = vrot.slane %v763_v35, %v3584_v28  ;;  %v764_v27 = vmul.f32 %v2742_v8, %v756_v18 }
 0x47c   : > { %v766_v13 = vmul.f32 %v762_v59, %v762_v59  ;;  %v793_v61 = vrot.slane %v762_v59, %v3590_v11 }
 0x47d   : > { %v769_v26 = vsub.f32 %v765_v10, %v767_v6  ;;  %v988_v7 = vpop.xlane.xlu1 %987 }
 0x47e   : > { %v798_v17 = vsel %vm555_vm4, %v797_v53, %v793_v61  ;;  %v768_v48 = vsub.f32 %v764_v27, %v766_v13  ;;  %v985_v22 = vpop.xlane.xlu0 %984 }
 0x47f   : > { %800 = vst.msk [vmem:[%s3600_s26 + $0x1] sm:$0x1] %vm558_vm5, %v798_v17  ;;  %v771_v9 = vmax.f32 %v769_v26, 0.0 }
 0x480   : > { %v2744_v43 = vpop.eup %2743  ;;  %v770_v38 = vmax.f32 %v768_v48, 0.0 }
 0x481   : > { %v2746_v40 = vpop.eup %2745  ;;  %v773_v34 = vadd.f32 1e-07, %v771_v9  ;;  %v1000_v39 = vmul.f32 %v2744_v43, %v988_v7  ;;  %v1219_v42 = vpop.xlane.xlu1 %1218 }
 0x482   : > { %v772_v44 = vadd.f32 1e-07, %v770_v38  ;;  %v999_v46 = vmul.f32 %v2746_v40, %v985_v22  ;;  %2747 = vrcp.f32 %v1219_v42  ;;  %v1216_v47 = vpop.xlane.xlu0 %1215 }
 0x483   : > { %2749 = vrsqrt.f32 %v773_v34  ;;  %v1034_v49 = vrot.slane %v1000_v39, %v3584_v28  ;;  %v1004_v16 = vmul.f32 %v1000_v39, %v1000_v39  ;;  %vm783_vm12 = vcmp.eq.f32.partialorder %v773_v34, inf }
 0x484   : > { %2751 = vrsqrt.f32 %v772_v44  ;;  %v1030_v50 = vrot.slane %v999_v46, %v3590_v11  ;;  %v1003_v54 = vmul.f32 %v999_v46, %v999_v46  ;;  %vm785_vm13 = vcmp.eq.f32.partialorder %v773_v34, 0.0 }
 0x485   : > { %v996_v51 = vpop.xlane.xlu1 %995  ;;  %2753 = vrcp.f32 %v1216_v47  ;;  %v786_v32 = vand.u32 2147483648, %v773_v34  ;;  %vm776_vm14 = vcmp.eq.f32.partialorder %v772_v44, inf  ;;  %vm778_vm15 = vcmp.eq.f32.partialorder %v772_v44, 0.0 }
 0x486   : > { %v1002_v52 = vmul.f32 %v2744_v43, %v996_v51  ;;  %v993_v4 = vpop.xlane.xlu0 %992  ;;  %v1035_v15 = vsel %vm555_vm4, %v1034_v49, %v1030_v50  ;;  %v779_v19 = vand.u32 2147483648, %v772_v44 }
 0x487   : > { %v1001_v41 = vmul.f32 %v2746_v40, %v993_v4  ;;  %1037 = vst.msk [vmem:[%s3600_s26 + $0x2] sm:$0x1] %vm558_vm5, %v1035_v15 }
 0x488   : > { %v1006_v55 = vsub.f32 %v1002_v52, %v1004_v16 }
 0x489   : > { %v1005_v3 = vsub.f32 %v1001_v41, %v1003_v54  ;;  %v1225_v56 = vpop.xlane.xlu1 %1224 }
 0x48a   : > { %v1008_v57 = vmax.f32 %v1006_v55, 0.0  ;;  %v1222_v58 = vpop.xlane.xlu0 %1221 }
 0x48b   : > { %v1007_v60 = vmax.f32 %v1005_v3, 0.0 }
 0x48c   : > { %v2748_v24 = vpop.eup %2747  ;;  %v3679_v14 = vadd.f32 1e-07, %v1008_v57 }
 0x48d   : > { %v2750_v23 = vpop.eup %2749  ;;  %v3681_v30 = vadd.f32 1e-07, %v1007_v60  ;;  %v1237_v62 = vmul.f32 %v2748_v24, %v1225_v56  ;;  %v1456_v29 = vpop.xlane.xlu1 %1455 }
 0x48e   : > { %v2752_v63 = vpop.eup %2751  ;;  %v782_v33 = vmul.f32 %v2750_v23, %v773_v34  ;;  %2755 = vrsqrt.f32 %v3679_v14  ;;  %v1453_v1 = vpop.xlane.xlu0 %1452  ;;  %vm1020_vm0 = vcmp.eq.f32.partialorder %v3679_v14, inf  ;;  %vm1022_vm1 = vcmp.eq.f32.partialorder %v3679_v14, 0.0 }
 0x48f   : > { %v775_v45 = vmul.f32 %v2752_v63, %v772_v44  ;;  %2757 = vrsqrt.f32 %v3681_v30  ;;  %v2754_v5 = vpop.eup %2753  ;;  %v1241_v0 = vmul.f32 %v1237_v62, %v1237_v62  ;;  %v1271_v36 = vrot.slane %v1237_v62, %v3584_v28 }
 0x490   : > { %v784_v25 = vsel %vm783_vm12, %v773_v34, %v782_v33  ;;  %v1236_v31 = vmul.f32 %v2754_v5, %v1222_v58  ;;  %2759 = vrcp.f32 %v1456_v29  ;;  %v1023_v42 = vand.u32 2147483648, %v3679_v14 }
 0x491   : > { %v787_v2 = vsel %vm785_vm13, %v786_v32, %v784_v25  ;;  %v777_v21 = vsel %vm776_vm14, %v772_v44, %v775_v45  ;;  %v1233_v8 = vpop.xlane.xlu1 %1232  ;;  %2761 = vrcp.f32 %v1453_v1  ;;  %vm1013_vm2 = vcmp.eq.f32.partialorder %v3681_v30, inf }
 0x492   : > { %v810_v35 = vrot.slane %v787_v2, %v3629_v12  ;;  %v780_v20 = vsel %vm778_vm15, %v779_v19, %v777_v21  ;;  %v1239_v59 = vmul.f32 %v2748_v24, %v1233_v8  ;;  %v1230_v10 = vpop.xlane.xlu0 %1229  ;;  %v1267_v6 = vrot.slane %v1236_v31, %v3590_v11 }
 0x493   : > { %v806_v18 = vrot.slane %v780_v20, %v3632_v37  ;;  %v1240_v53 = vmul.f32 %v1236_v31, %v1236_v31  ;;  %v1238_v13 = vmul.f32 %v2754_v5, %v1230_v10  ;;  %v1016_v49 = vand.u32 2147483648, %v3681_v30 }
 0x494   : > { %v1243_v27 = vsub.f32 %v1239_v59, %v1241_v0  ;;  %v1272_v26 = vsel %vm555_vm4, %v1271_v36, %v1267_v6  ;;  %vm1015_vm3 = vcmp.eq.f32.partialorder %v3681_v30, 0.0 }
 0x495   : > { %v811_v61 = vsel %vm572_vm10, %v810_v35, %v806_v18  ;;  %v1462_v7 = vpop.xlane.xlu1 %1461  ;;  %1274 = vst.msk [vmem:[%s3600_s26 + $0x3] sm:$0x1] %vm558_vm5, %v1272_v26  ;;  %v1242_v48 = vsub.f32 %v1238_v13, %v1240_v53 }
 0x496   : > { %v1245_v17 = vmax.f32 %v1243_v27, 0.0  ;;  %v1459_v22 = vpop.xlane.xlu0 %1458  ;;  %813 = vst.msk [vmem:[%s3600_s26 + $0x1] sm:$0x1] %vm575_vm11, %v811_v61 }
 0x497   : > { %v1244_v38 = vmax.f32 %v1242_v48, 0.0 }
 0x498   : > { %v2756_v9 = vpop.eup %2755  ;;  %v3695_v43 = vadd.f32 1e-07, %v1245_v17 }
 0x499   : > { %v2758_v40 = vpop.eup %2757  ;;  %v1019_v34 = vmul.f32 %v2756_v9, %v3679_v14  ;;  %v1693_v39 = vpop.xlane.xlu1 %1692  ;;  %v1246_v50 = vadd.f32 1e-07, %v1244_v38 }
 0x49a   : > { %v1012_v44 = vmul.f32 %v2758_v40, %v3681_v30  ;;  %2763 = vrsqrt.f32 %v3695_v43  ;;  %v1690_v46 = vpop.xlane.xlu0 %1689  ;;  %v2760_v51 = vpop.eup %2759  ;;  %vm1257_vm6 = vcmp.eq.f32.partialorder %v3695_v43, inf  ;;  %vm1259_vm7 = vcmp.eq.f32.partialorder %v3695_v43, 0.0 }
 0x49b   : > { %v1021_v47 = vsel %vm1020_vm0, %v3679_v14, %v1019_v34  ;;  %2765 = vrcp.f32 %v1693_v39  ;;  %v2762_v4 = vpop.eup %2761  ;;  %v1474_v3 = vmul.f32 %v2760_v51, %v1462_v7  ;;  %v1260_v36 = vand.u32 2147483648, %v3695_v43 }
 0x49c   : > { %v1024_v16 = vsel %vm1022_vm1, %v1023_v42, %v1021_v47  ;;  %v1014_v52 = vsel %vm1013_vm2, %v3681_v30, %v1012_v44  ;;  %2767 = vrcp.f32 %v1690_v46  ;;  %v1473_v57 = vmul.f32 %v2762_v4, %v1459_v22 }
 0x49d   : > { %v1047_v54 = vrot.slane %v1024_v16, %v3629_v12  ;;  %v1017_v15 = vsel %vm1015_vm3, %v1016_v49, %v1014_v52  ;;  %2769 = vrsqrt.f32 %v1246_v50  ;;  %v1470_v41 = vpop.xlane.xlu1 %1469  ;;  %v1478_v14 = vmul.f32 %v1474_v3, %v1474_v3 }
 0x49e   : > { %v1043_v55 = vrot.slane %v1017_v15, %v3632_v37  ;;  %v1467_v56 = vpop.xlane.xlu0 %1466  ;;  %v1476_v58 = vmul.f32 %v2760_v51, %v1470_v41  ;;  %v1508_v23 = vrot.slane %v1474_v3, %v3584_v28  ;;  %v1477_v30 = vmul.f32 %v1473_v57, %v1473_v57 }
 0x49f   : > { %v1475_v60 = vmul.f32 %v2762_v4, %v1467_v56  ;;  %v1504_v62 = vrot.slane %v1473_v57, %v3590_v11  ;;  %vm1250_vm8 = vcmp.eq.f32.partialorder %v1246_v50, inf  ;;  %v1253_v27 = vand.u32 2147483648, %v1246_v50 }
 0x4a0   : > { %v1048_v24 = vsel %vm572_vm10, %v1047_v54, %v1043_v55  ;;  %v1480_v63 = vsub.f32 %v1476_v58, %v1478_v14  ;;  %vm1252_vm9 = vcmp.eq.f32.partialorder %v1246_v50, 0.0 }
 0x4a1   : > { %v1699_v29 = vpop.xlane.xlu1 %1698  ;;  %1050 = vst.msk [vmem:[%s3600_s26 + $0x2] sm:$0x1] %vm575_vm11, %v1048_v24  ;;  %v1509_v1 = vsel %vm555_vm4, %v1508_v23, %v1504_v62  ;;  %v1479_v32 = vsub.f32 %v1475_v60, %v1477_v30 }
 0x4a2   : > { %v1696_v33 = vpop.xlane.xlu0 %1695  ;;  %1511 = vst.msk [vmem:[%s3600_s26 + $0x4] sm:$0x1] %vm558_vm5, %v1509_v1  ;;  %v1482_v5 = vmax.f32 %v1480_v63, 0.0 }
 0x4a3   : > { %v1481_v0 = vmax.f32 %v1479_v32, 0.0 }
 0x4a4   : > { %v2764_v45 = vpop.eup %2763  ;;  %v1484_v31 = vadd.f32 1e-07, %v1482_v5 }
 0x4a5   : > { %v2766_v25 = vpop.eup %2765  ;;  %v1256_v19 = vmul.f32 %v2764_v45, %v3695_v43  ;;  %v1930_v2 = vpop.xlane.xlu1 %1929  ;;  %v1483_v59 = vadd.f32 1e-07, %v1481_v0 }
 0x4a6   : > { %v2768_v21 = vpop.eup %2767  ;;  %2771 = vrcp.f32 %v1930_v2  ;;  %v1927_v8 = vpop.xlane.xlu0 %1926  ;;  %v1711_v10 = vmul.f32 %v2766_v25, %v1699_v29  ;;  %vm1494_vm12 = vcmp.eq.f32.partialorder %v1484_v31, inf  ;;  %vm1496_vm13 = vcmp.eq.f32.partialorder %v1484_v31, 0.0 }
 0x4a7   : > { %v2770_v35 = vpop.eup %2769  ;;  %v1258_v20 = vsel %vm1257_vm6, %v3695_v43, %v1256_v19  ;;  %2773 = vrcp.f32 %v1927_v8  ;;  %v1710_v53 = vmul.f32 %v2768_v21, %v1696_v33  ;;  %v1497_v44 = vand.u32 2147483648, %v1484_v31 }
 0x4a8   : > { %v1261_v18 = vsel %vm1259_vm7, %v1260_v36, %v1258_v20  ;;  %v1249_v6 = vmul.f32 %v2770_v35, %v1246_v50  ;;  %2775 = vrsqrt.f32 %v1484_v31  ;;  %v1745_v48 = vrot.slane %v1711_v10, %v3584_v28 }
 0x4a9   : > { %2777 = vrsqrt.f32 %v1483_v59  ;;  %v1936_v13 = vpop.xlane.xlu1 %1935  ;;  %v1284_v61 = vrot.slane %v1261_v18, %v3629_v12  ;;  %v1741_v9 = vrot.slane %v1710_v53, %v3590_v11  ;;  %vm1487_vm14 = vcmp.eq.f32.partialorder %v1483_v59, inf }
 0x4aa   : > { %v1251_v26 = vsel %vm1250_vm8, %v1246_v50, %v1249_v6  ;;  %v1933_v7 = vpop.xlane.xlu0 %1932  ;;  %v1715_v50 = vmul.f32 %v1711_v10, %v1711_v10  ;;  %v1714_v15 = vmul.f32 %v1710_v53, %v1710_v53  ;;  %vm1489_vm15 = vcmp.eq.f32.partialorder %v1483_v59, 0.0 }
 0x4ab   : > { %v1254_v17 = vsel %vm1252_vm9, %v1253_v27, %v1251_v26  ;;  %v1746_v40 = vsel %vm555_vm4, %v1745_v48, %v1741_v9  ;;  %v1490_v60 = vand.u32 2147483648, %v1483_v59 }
 0x4ac   : > { %v1280_v22 = vrot.slane %v1254_v17, %v3632_v37  ;;  %1748 = vst.msk [vmem:[%s3600_s26 + $0x5] sm:$0x1] %vm558_vm5, %v1746_v40 }
 0x4ad   : > { %v2167_v43 = vpop.xlane.xlu1 %2166 }
 0x4ae   : > { %v1285_v38 = vsel %vm572_vm10, %v1284_v61, %v1280_v22  ;;  %v2164_v34 = vpop.xlane.xlu0 %2163  ;;  %2779 = vrcp.f32 %v2167_v43 }
 0x4af   : > { %1287 = vst.msk [vmem:[%s3600_s26 + $0x3] sm:$0x1] %vm575_vm11, %v1285_v38  ;;  %2781 = vrcp.f32 %v2164_v34 }
 0x4b0   : > { %v2772_v39 = vpop.eup %2771 }
 0x4b1   : > { %v2774_v42 = vpop.eup %2773  ;;  %v1948_v46 = vmul.f32 %v2772_v39, %v1936_v13  ;;  %v1707_v47 = vpop.xlane.xlu1 %1706 }
 0x4b2   : > { %v2776_v49 = vpop.eup %2775  ;;  %v1947_v51 = vmul.f32 %v2774_v42, %v1933_v7  ;;  %v1713_v16 = vmul.f32 %v2766_v25, %v1707_v47  ;;  %v1704_v52 = vpop.xlane.xlu0 %1703 }
 0x4b3   : > { %v2778_v4 = vpop.eup %2777  ;;  %v1493_v54 = vmul.f32 %v2776_v49, %v1484_v31  ;;  %v1982_v41 = vrot.slane %v1948_v46, %v3584_v28  ;;  %v1712_v55 = vmul.f32 %v2768_v21, %v1704_v52  ;;  %v1952_v24 = vmul.f32 %v1948_v46, %v1948_v46 }
 0x4b4   : > { %v1486_v3 = vmul.f32 %v2778_v4, %v1483_v59  ;;  %v1978_v56 = vrot.slane %v1947_v51, %v3590_v11  ;;  %v1717_v57 = vsub.f32 %v1713_v16, %v1715_v50  ;;  %v1951_v20 = vmul.f32 %v1947_v51, %v1947_v51 }
 0x4b5   : > { %v1495_v58 = vsel %vm1494_vm12, %v1484_v31, %v1493_v54  ;;  %v1716_v14 = vsub.f32 %v1712_v55, %v1714_v15  ;;  %v1944_v23 = vpop.xlane.xlu1 %1943 }
 0x4b6   : > { %v1498_v30 = vsel %vm1496_vm13, %v1497_v44, %v1495_v58  ;;  %v1488_v62 = vsel %vm1487_vm14, %v1483_v59, %v1486_v3  ;;  %v1983_v29 = vsel %vm555_vm4, %v1982_v41, %v1978_v56  ;;  %v1719_v63 = vmax.f32 %v1717_v57, 0.0  ;;  %v1941_v33 = vpop.xlane.xlu0 %1940 }
 0x4b7   : > { %v1521_v1 = vrot.slane %v1498_v30, %v3629_v12  ;;  %v1491_v32 = vsel %vm1489_vm15, %v1490_v60, %v1488_v62  ;;  %1985 = vst.msk [vmem:[%s3600_s26 + $0x6] sm:$0x1] %vm558_vm5, %v1983_v29  ;;  %v1718_v45 = vmax.f32 %v1716_v14, 0.0  ;;  %v1950_v5 = vmul.f32 %v2772_v39, %v1944_v23 }
 0x4b8   : > { %v1517_v25 = vrot.slane %v1491_v32, %v3632_v37  ;;  %v1721_v19 = vadd.f32 1e-07, %v1719_v63  ;;  %v1949_v0 = vmul.f32 %v2774_v42, %v1941_v33  ;;  %v2780_v2 = vpop.eup %2779 }
 0x4b9   : > { %v1720_v21 = vadd.f32 1e-07, %v1718_v45  ;;  %v1954_v36 = vsub.f32 %v1950_v5, %v1952_v24  ;;  %v2173_v31 = vpop.xlane.xlu1 %2172  ;;  %v2782_v8 = vpop.eup %2781 }
 0x4ba   : > { %v1522_v35 = vsel %vm572_vm10, %v1521_v1, %v1517_v25  ;;  %2783 = vrsqrt.f32 %v1721_v19  ;;  %v2170_v59 = vpop.xlane.xlu0 %2169  ;;  %v1953_v18 = vsub.f32 %v1949_v0, %v1951_v20  ;;  %v2185_v6 = vmul.f32 %v2780_v2, %v2173_v31 }
 0x4bb   : > { %2785 = vrsqrt.f32 %v1720_v21  ;;  %1524 = vst.msk [vmem:[%s3600_s26 + $0x4] sm:$0x1] %vm575_vm11, %v1522_v35  ;;  %v1956_v10 = vmax.f32 %v1954_v36, 0.0  ;;  %v2184_v53 = vmul.f32 %v2782_v8, %v2170_v59  ;;  %vm1731_vm0 = vcmp.eq.f32.partialorder %v1721_v19, inf }
 0x4bc   : > { %v1955_v61 = vmax.f32 %v1953_v18, 0.0  ;;  %v2189_v26 = vmul.f32 %v2185_v6, %v2185_v6  ;;  %v2219_v7 = vrot.slane %v2185_v6, %v3584_v28  ;;  %v1734_v49 = vand.u32 2147483648, %v1721_v19 }
 0x4bd   : > { %v2181_v27 = vpop.xlane.xlu1 %2180  ;;  %v1958_v13 = vadd.f32 1e-07, %v1956_v10  ;;  %v2188_v48 = vmul.f32 %v2184_v53, %v2184_v53  ;;  %v2215_v22 = vrot.slane %v2184_v53, %v3590_v11  ;;  %vm1733_vm1 = vcmp.eq.f32.partialorder %v1721_v19, 0.0 }
 0x4be   : > { %v2178_v17 = vpop.xlane.xlu0 %2177  ;;  %v2187_v9 = vmul.f32 %v2780_v2, %v2181_v27  ;;  %v1957_v38 = vadd.f32 1e-07, %v1955_v61  ;;  %vm1724_vm2 = vcmp.eq.f32.partialorder %v1720_v21, inf  ;;  %v1727_v52 = vand.u32 2147483648, %v1720_v21 }
 0x4bf   : > { %v2186_v43 = vmul.f32 %v2782_v8, %v2178_v17  ;;  %2787 = vrsqrt.f32 %v1958_v13  ;;  %v2220_v40 = vsel %vm555_vm4, %v2219_v7, %v2215_v22  ;;  %vm1726_vm4 = vcmp.eq.f32.partialorder %v1720_v21, 0.0 }
 0x4c0   : > { %v2191_v34 = vsub.f32 %v2187_v9, %v2189_v26  ;;  %2222 = vst.msk [vmem:[%s3600_s26 + $0x7] sm:$0x1] %vm558_vm5, %v2220_v40  ;;  %2789 = vrsqrt.f32 %v1957_v38  ;;  %vm1968_vm5 = vcmp.eq.f32.partialorder %v1958_v13, inf  ;;  %v1971_v58 = vand.u32 2147483648, %v1958_v13 }
 0x4c1   : > { %v2190_v39 = vsub.f32 %v2186_v43, %v2188_v48  ;;  %vm1970_vm3 = vcmp.eq.f32.partialorder %v1958_v13, 0.0  ;;  %vm1961_vm6 = vcmp.eq.f32.partialorder %v1957_v38, inf  ;;  %v1964_v30 = vand.u32 2147483648, %v1957_v38 }
 0x4c2   : > { %v2193_v44 = vmax.f32 %v2191_v34, 0.0  ;;  %vm1963_vm7 = vcmp.eq.f32.partialorder %v1957_v38, 0.0 }
 0x4c3   : > { %v2192_v46 = vmax.f32 %v2190_v39, 0.0 }
 0x4c4   : > { %v2784_v42 = vpop.eup %2783  ;;  %v2195_v11 = vadd.f32 1e-07, %v2193_v44 }
 0x4c5   : > { %v2786_v47 = vpop.eup %2785  ;;  %v1730_v28 = vmul.f32 %v2784_v42, %v1721_v19  ;;  %v2194_v51 = vadd.f32 1e-07, %v2192_v46 }
 0x4c6   : > { %v1723_v50 = vmul.f32 %v2786_v47, %v1720_v21  ;;  %2791 = vrsqrt.f32 %v2195_v11  ;;  %vm2205_vm8 = vcmp.eq.f32.partialorder %v2195_v11, inf  ;;  %v2208_v25 = vand.u32 2147483648, %v2195_v11 }
 0x4c7   : > { %v1732_v16 = vsel %vm1731_vm0, %v1721_v19, %v1730_v28  ;;  %2793 = vrsqrt.f32 %v2194_v51  ;;  %vm2207_vm9 = vcmp.eq.f32.partialorder %v2195_v11, 0.0  ;;  %vm2198_vm12 = vcmp.eq.f32.partialorder %v2194_v51, inf }
 0x4c8   : > { %v1735_v4 = vsel %vm1733_vm1, %v1734_v49, %v1732_v16  ;;  %v1725_v54 = vsel %vm1724_vm2, %v1720_v21, %v1723_v50  ;;  %v2201_v21 = vand.u32 2147483648, %v2194_v51  ;;  %vm2200_vm13 = vcmp.eq.f32.partialorder %v2194_v51, 0.0 }
 0x4c9   : > { %v1758_v15 = vrot.slane %v1735_v4, %v3629_v12  ;;  %v1728_v41 = vsel %vm1726_vm4, %v1727_v52, %v1725_v54  ;;  %v2788_v55 = vpop.eup %2787 }
 0x4ca   : > { %v1754_v3 = vrot.slane %v1728_v41, %v3632_v37  ;;  %v1967_v56 = vmul.f32 %v2788_v55, %v1958_v13  ;;  %v2790_v60 = vpop.eup %2789 }
 0x4cb   : > { %v1960_v23 = vmul.f32 %v2790_v60, %v1957_v38 }
 0x4cc   : > { %v1759_v57 = vsel %vm572_vm10, %v1758_v15, %v1754_v3  ;;  %v1969_v24 = vsel %vm1968_vm5, %v1958_v13, %v1967_v56 }
 0x4cd   : > { %1761 = vst.msk [vmem:[%s3600_s26 + $0x5] sm:$0x1] %vm575_vm11, %v1759_v57  ;;  %v1972_v14 = vsel %vm1970_vm3, %v1971_v58, %v1969_v24  ;;  %v1962_v29 = vsel %vm1961_vm6, %v1957_v38, %v1960_v23 }
 0x4ce   : > { %v1995_v62 = vrot.slane %v1972_v14, %v3629_v12  ;;  %v1965_v63 = vsel %vm1963_vm7, %v1964_v30, %v1962_v29 }
 0x4cf   : > { %v1991_v1 = vrot.slane %v1965_v63, %v3632_v37 }
 0x4d0   : > { %v2792_v33 = vpop.eup %2791 }
 0x4d1   : > { %v2204_v32 = vmul.f32 %v2792_v33, %v2195_v11  ;;  %v2794_v45 = vpop.eup %2793  ;;  %v1996_v5 = vsel %vm572_vm10, %v1995_v62, %v1991_v1 }
 0x4d2   : > { %v2197_v0 = vmul.f32 %v2794_v45, %v2194_v51  ;;  %1998 = vst.msk [vmem:[%s3600_s26 + $0x6] sm:$0x1] %vm575_vm11, %v1996_v5 }
 0x4d3   : > { %v2206_v19 = vsel %vm2205_vm8, %v2195_v11, %v2204_v32 }
 0x4d4   : > { %v2209_v2 = vsel %vm2207_vm9, %v2208_v25, %v2206_v19  ;;  %v2199_v31 = vsel %vm2198_vm12, %v2194_v51, %v2197_v0 }
 0x4d5   : > { %v2232_v36 = vrot.slane %v2209_v2, %v3629_v12  ;;  %v2202_v8 = vsel %vm2200_vm13, %v2201_v21, %v2199_v31 }
 0x4d6   : > { %v2228_v35 = vrot.slane %v2202_v8, %v3632_v37 }
 0x4d8   : > { %v2233_v20 = vsel %vm572_vm10, %v2232_v36, %v2228_v35 }
 0x4d9   : > { %2235 = vst.msk [vmem:[%s3600_s26 + $0x7] sm:$0x1] %vm575_vm11, %v2233_v20 }
 0x4da   : > { %2950 = shalt.err (!%p2947_p13)
}
 0x4db   : > { %s2951_s7 = scalar_lea.hbm %s3768_s13, 128  ;;  %s2955_s9 = scalar_lea.hbm %s3820_s5, 256 }
 0x4dc   : > { %p2952_p0 = scmp.ne.s32.totalorder %s3768_s13, %s2951_s7  ;;  %p2956_p9 = scmp.lt.u32.totalorder %s3768_s13, %s3820_s5 }
 0x4dd   : > { %p2957_p12 = scmp.lt.u32.totalorder %s2955_s9, %s2951_s7  ;;  %p2959_p4 = scmp.lt.u32.totalorder %s2951_s7, %s3768_s13 }
 0x4de   : > { %p2953_p5 = pnand %p2952_p0, %p3213_p1 }
 0x4df   : > { %p2958_p2 = por %p2957_p12, %p2956_p9 }
 0x4e0   : > { %p2954_p11 = pneg %p2953_p5 }
 0x4e1   : > { %p2960_p6 = por %p2959_p4, %p2958_p2 }
 0x4e3   : > { %p2961_p8 = pnand %p2960_p6, %p2954_p11 }
 0x4e5   : > { %2964 = shalt.err (!%p2961_p8)
}
 0x4e6   : > { %2606 = dma.vmem_to_hbm [thread:$0]  (%p3213_p1), %s3770_s16, 128, %s3768_s13, %s2237_s30  }
 0x4e7 PF: > { %s2262_s26 = sand.u32 1, %s2999_s18   ;;  %p3838_p3 = scmp.ne.s32.totalorder %s3825_s25, 0 }
 0x4e8   : > { %p3839_p7 = scmp.ge.s32.totalorder %s3011_s21, 2  ;;  %s2263_s15 = scalar_lea.sflag [#allocation4], %s2262_s26 }
 0x4ea   : > { %p2626_p10 = pnand %p3839_p7, %p3838_p3 }
 0x4ec   : > { %2994 = dma.done.wait (!%p2626_p10), %s2263_s15, 128  }
 0x4ed   : > { %2996 = vsyncadd (!%p2626_p10), %s2263_s15, 4294967168  ;;  %p20_p13 = scmp.ge.s32.totalorder %s3203_s14, 4   ;;  %s3840_s18 = smov %s3003_s19 }
 0x4ee   : > { %s3841_s19 = smov %s3007_s20  ;;  %s3842_s20 = smov %s3219_s27 }
 0x4ef   : > { %s3843_s21 = smov %s3203_s14  ;;  %22 = sbr.rel (!%p20_p13) target bundleno = 7 (0x7), region = 108 }
 0x4f6   :  { %2268 = vsyncpa [#allocation3], 1 }
 0x4f7   :  { %2270 = vsyncpa [#allocation3 + $0x1], 1 }
 0x4f8   :  { %2271 = vsyncpa [#allocation6], 1 }
 0x4f9   :  { %2272 = vsyncpa [#allocation9], 1 }
 0x4fa   :  { %2273 = vsyncpa [#allocation4], 1 }
 0x4fb   :  { %2275 = vsyncpa [#allocation4 + $0x1], 1 }

</bundles_post_ra>
